<compile_context>
chip_gen: v6e
topology: v6e:2x2x1
jax: 0.10.0
libtpu: 0.0.40
codegen_flags: <defaults>
</compile_context>

<pallas_src>
import jax
import jax.numpy as jnp
from jax.experimental import pallas as pl
from jax.experimental.pallas import tpu as pltpu


def _sigmoid(z):
    # Divide-free sigmoid (EUP tanh instead of VALU divide), exact same math.
    return 0.5 * (jnp.tanh(0.5 * z) + 1.0)


def _bilstm_kernel(x_ref, wih_f_ref, whh_f_ref, b_f_ref,
                   wih_b_ref, whh_b_ref, b_b_ref,
                   h0f_ref, c0f_ref, h0b_ref, c0b_ref,
                   wfc_f_ref, wfc_b_ref, b_fc_ref,
                   out_ref, h_scr, c_scr):
    # x_ref:        (Tt, TB, C)  current time-slab (compute dtype)
    # wih_*_ref:    (C, 4H)      LSTM input weights, pre-transposed (gate order i,f,g,o)
    # whh_*_ref:    (H, 4H)      LSTM recurrent weights, pre-transposed
    # b_*_ref:      (1, 4H) f32  b_ih + b_hh
    # h0*/c0*_ref:  (TB, H) f32  initial states (forward / reverse direction)
    # wfc_*_ref:    (H, n_class) fc weight halves, pre-transposed
    # b_fc_ref:     (1, n_class) f32
    # out_ref:      (TB, n_class) f32
    # h_scr, c_scr: (TB, H) f32  running forward hidden / cell state
    tblk = pl.program_id(1)
    n_tblk = pl.num_programs(1)
    Tt, TB, C = x_ref.shape
    H = h0f_ref.shape[1]
    cdt = whh_f_ref.dtype            # MXU compute dtype (bf16 or f32)

    @pl.when(tblk == 0)
    def _init():
        h_scr[...] = h0f_ref[...]
        c_scr[...] = c0f_ref[...]

    # Hoisted input projection for the whole slab: ONE MXU GEMM with M = Tt*TB,
    # bias folded in (the per-step broadcast add disappears from the serial path).
    x_flat = x_ref[...].reshape(Tt * TB, C)
    xw_all = (jnp.dot(x_flat, wih_f_ref[...],
                      preferred_element_type=jnp.float32)
              + b_f_ref[...])                                    # (Tt*TB, 4H) f32

    def lstm_cell(xw, h_prev, c_prev, whh_ref):
        # xw already contains x@Wih + (b_ih + b_hh); only h@Whh stays serial.
        gates = xw + jnp.dot(h_prev.astype(cdt), whh_ref[...],
                             preferred_element_type=jnp.float32)  # (TB, 4H)
        # NOTE: with H a multiple of 128 these slices are lane-aligned (free);
        # at small H they are masked sub-lane extracts (acceptable for demo).
        i = _sigmoid(gates[:, 0 * H:1 * H])
        f = _sigmoid(gates[:, 1 * H:2 * H])
        g = jnp.tanh(gates[:, 2 * H:3 * H])
        o = _sigmoid(gates[:, 3 * H:4 * H])
        c_new = f * c_prev + i * g
        h_new = o * jnp.tanh(c_new)
        return h_new, c_new

    # Forward recurrence over the Tt steps of this slab.  Static Python unroll
    # (equivalent to lax.fori_loop(..., unroll=True) at these trip counts and
    # keeps every xw slice / gate slice static).
    h = h_scr[...]
    c = c_scr[...]
    for s in range(Tt):
        h, c = lstm_cell(xw_all[s * TB:(s + 1) * TB, :], h, c, whh_f_ref)
    h_scr[...] = h
    c_scr[...] = c

    @pl.when(tblk == n_tblk - 1)
    def _finalize():
        # Reverse direction: outputs[-1] only needs its first step, i.e. one
        # LSTM cell applied to x[T-1] starting from (h0_rev, c0_rev).
        x_last = x_ref[Tt - 1]                                   # (TB, C)
        xw_b = (jnp.dot(x_last, wih_b_ref[...],
                        preferred_element_type=jnp.float32)
                + b_b_ref[...])
        h_b, _ = lstm_cell(xw_b, h0b_ref[...], c0b_ref[...], whh_b_ref)
        # Fused fc: concat(h_fwd, h_bwd) @ W_fc.T + b_fc, with W_fc pre-split.
        out_ref[...] = (
            jnp.dot(h.astype(cdt), wfc_f_ref[...],
                    preferred_element_type=jnp.float32)
            + jnp.dot(h_b.astype(cdt), wfc_b_ref[...],
                      preferred_element_type=jnp.float32)
            + b_fc_ref[...]).astype(out_ref.dtype)


def bilstm_forward(x, params, h0, c0, *, batch_block=None, time_block=None,
                   compute_dtype=jnp.bfloat16):
    """x: (B, T, C); params: torch-layout weights; h0/c0: (2, B, H).
    Returns (B, n_class), matching BiLSTM.forward with explicit (h0, c0).

    batch_block: batch tile (multiple of 8; pick nb>=2 on v7x so both TCs work).
    time_block:  time steps folded into one grid iteration (amortizes per-grid-
                 step overhead and feeds the hoisted input-projection GEMM).
    compute_dtype: dtype of MXU operands (bf16 recommended on v6e/v7x);
                 accumulation, state and gate math stay float32.
    """
    B, T, C = x.shape
    H = params["weight_hh_l0"].shape[1]
    n_class = params["fc_weight"].shape[0]

    if batch_block is None:
        batch_block = B
    if batch_block != B:
        assert batch_block % 8 == 0, "batch_block must be a multiple of 8"
    assert B % batch_block == 0
    TB = batch_block
    nb = B // TB

    if time_block is None:
        time_block = min(T, 16)
    assert T % time_block == 0, "time_block must divide T"
    Tt = time_block
    n_tblk = T // Tt

    f32 = jnp.float32
    cdt = compute_dtype
    x_tbc = jnp.transpose(x, (1, 0, 2)).astype(cdt)              # (T, B, C)

    wih_f = params["weight_ih_l0"].T.astype(cdt)                 # (C, 4H)
    whh_f = params["weight_hh_l0"].T.astype(cdt)                 # (H, 4H)
    b_f = (params["bias_ih_l0"]
           + params["bias_hh_l0"]).astype(f32).reshape(1, 4 * H)
    wih_b = params["weight_ih_l0_reverse"].T.astype(cdt)
    whh_b = params["weight_hh_l0_reverse"].T.astype(cdt)
    b_b = (params["bias_ih_l0_reverse"]
           + params["bias_hh_l0_reverse"]).astype(f32).reshape(1, 4 * H)
    wfc = params["fc_weight"].astype(f32)                        # (n_class, 2H)
    wfc_f = wfc[:, :H].T.astype(cdt)                             # (H, n_class)
    wfc_b = wfc[:, H:].T.astype(cdt)                             # (H, n_class)
    b_fc = params["fc_bias"].astype(f32).reshape(1, n_class)

    h0f, h0b = h0[0].astype(f32), h0[1].astype(f32)              # (B, H)
    c0f, c0b = c0[0].astype(f32), c0[1].astype(f32)

    full2 = lambda b, t: (0, 0)
    batch2 = lambda b, t: (b, 0)

    out = pl.pallas_call(
        _bilstm_kernel,
        out_shape=jax.ShapeDtypeStruct((B, n_class), f32),
        grid=(nb, n_tblk),
        in_specs=[
            pl.BlockSpec((Tt, TB, C), lambda b, t: (t, b, 0)),   # x time slab
            pl.BlockSpec((C, 4 * H), full2),                     # wih_f
            pl.BlockSpec((H, 4 * H), full2),                     # whh_f
            pl.BlockSpec((1, 4 * H), full2),                     # b_f
            pl.BlockSpec((C, 4 * H), full2),                     # wih_b
            pl.BlockSpec((H, 4 * H), full2),                     # whh_b
            pl.BlockSpec((1, 4 * H), full2),                     # b_b
            pl.BlockSpec((TB, H), batch2),                       # h0 fwd
            pl.BlockSpec((TB, H), batch2),                       # c0 fwd
            pl.BlockSpec((TB, H), batch2),                       # h0 rev
            pl.BlockSpec((TB, H), batch2),                       # c0 rev
            pl.BlockSpec((H, n_class), full2),                   # wfc_f
            pl.BlockSpec((H, n_class), full2),                   # wfc_b
            pl.BlockSpec((1, n_class), full2),                   # b_fc
        ],
        out_specs=pl.BlockSpec((TB, n_class), batch2),
        scratch_shapes=[pltpu.VMEM((TB, H), f32),                # h state
                        pltpu.VMEM((TB, H), f32)],               # c state
        compiler_params=pltpu.CompilerParams(
            dimension_semantics=("parallel", "arbitrary")),
    )(x_tbc, wih_f, whh_f, b_f, wih_b, whh_b, b_b,
      h0f, c0f, h0b, c0b, wfc_f, wfc_b, b_fc)
    return out


# ---------------- pure-JAX reference (full bidirectional LSTM) ----------------

def _lstm_scan(x_tbc, wih, whh, bih, bhh, h0, c0):
    def step(carry, x_t):
        h, c = carry
        gates = x_t @ wih.T + h @ whh.T + bih + bhh
        i, f, g, o = jnp.split(gates, 4, axis=-1)
        c = jax.nn.sigmoid(f) * c + jax.nn.sigmoid(i) * jnp.tanh(g)
        h = jax.nn.sigmoid(o) * jnp.tanh(c)
        return (h, c), h
    _, hs = jax.lax.scan(step, (h0, c0), x_tbc)
    return hs                                                    # (T, B, H)


def _reference(x, params, h0, c0):
    x_tbc = jnp.transpose(x, (1, 0, 2))
    hs_f = _lstm_scan(x_tbc, params["weight_ih_l0"], params["weight_hh_l0"],
                      params["bias_ih_l0"], params["bias_hh_l0"],
                      h0[0], c0[0])
    hs_b_rev = _lstm_scan(x_tbc[::-1], params["weight_ih_l0_reverse"],
                          params["weight_hh_l0_reverse"],
                          params["bias_ih_l0_reverse"],
                          params["bias_hh_l0_reverse"],
                          h0[1], c0[1])
    hs_b = hs_b_rev[::-1]
    outputs = jnp.concatenate([hs_f, hs_b], axis=-1)             # (T, B, 2H)
    last = outputs[-1]                                           # (B, 2H)
    return last @ params["fc_weight"].T + params["fc_bias"]


if __name__ == "__main__":
    # batch, max_len, n_class, n_hidden
    B, T, C, H = 16, 16, 16, 32

    key = jax.random.PRNGKey(0)
    ks = iter(jax.random.split(key, 16))

    def rnd(shape, scale=0.1):
        return scale * jax.random.normal(next(ks), shape, dtype=jnp.float32)

    params = {
        "weight_ih_l0": rnd((4 * H, C)),
        "weight_hh_l0": rnd((4 * H, H)),
        "bias_ih_l0": rnd((4 * H,)),
        "bias_hh_l0": rnd((4 * H,)),
        "weight_ih_l0_reverse": rnd((4 * H, C)),
        "weight_hh_l0_reverse": rnd((4 * H, H)),
        "bias_ih_l0_reverse": rnd((4 * H,)),
        "bias_hh_l0_reverse": rnd((4 * H,)),
        "fc_weight": rnd((C, 2 * H)),
        "fc_bias": rnd((C,)),
    }
    x = jax.random.normal(next(ks), (B, T, C), dtype=jnp.float32)
    # The torch module draws h0/c0 with torch.randn inside forward; here they
    # are drawn deterministically and passed in explicitly.
    h0 = jax.random.normal(next(ks), (2, B, H), dtype=jnp.float32)
    c0 = jax.random.normal(next(ks), (2, B, H), dtype=jnp.float32)

    ref = _reference(x, params, h0, c0)

    # Exact-math path (f32 MXU operands): tight tolerance vs. reference.
    out_f32 = bilstm_forward(x, params, h0, c0,
                             batch_block=8, time_block=8,
                             compute_dtype=jnp.float32)
    jax.block_until_ready(out_f32)
    assert out_f32.shape == (B, C)
    err_f32 = float(jnp.max(jnp.abs(out_f32 - ref)))
    assert jnp.allclose(out_f32, ref, atol=1e-4, rtol=1e-4), err_f32

    # Fast path (bf16 MXU operands, f32 accumulation/state): looser tolerance.
    out_bf16 = bilstm_forward(x, params, h0, c0,
                              batch_block=8, time_block=8,
                              compute_dtype=jnp.bfloat16)
    jax.block_until_ready(out_bf16)
    err_bf16 = float(jnp.max(jnp.abs(out_bf16 - ref)))
    assert jnp.allclose(out_bf16, ref, atol=3e-2, rtol=3e-2), err_bf16

    print("KERNEL_OK")
</pallas_src>

<mosaic_0001>
module attributes {stable_mosaic.version = 11 : i64} {
  func.func @_bilstm_kernel(%arg0: i32, %arg1: i32, %arg2: memref<8x8x16xf32, #tpu.memory_space<vmem>>, %arg3: memref<16x128xf32, #tpu.memory_space<vmem>>, %arg4: memref<32x128xf32, #tpu.memory_space<vmem>>, %arg5: memref<1x128xf32, #tpu.memory_space<vmem>>, %arg6: memref<16x128xf32, #tpu.memory_space<vmem>>, %arg7: memref<32x128xf32, #tpu.memory_space<vmem>>, %arg8: memref<1x128xf32, #tpu.memory_space<vmem>>, %arg9: memref<8x32xf32, #tpu.memory_space<vmem>>, %arg10: memref<8x32xf32, #tpu.memory_space<vmem>>, %arg11: memref<8x32xf32, #tpu.memory_space<vmem>>, %arg12: memref<8x32xf32, #tpu.memory_space<vmem>>, %arg13: memref<32x16xf32, #tpu.memory_space<vmem>>, %arg14: memref<32x16xf32, #tpu.memory_space<vmem>>, %arg15: memref<1x16xf32, #tpu.memory_space<vmem>>, %arg16: memref<8x16xf32, #tpu.memory_space<vmem>>, %arg17: memref<8x32xf32, #tpu.memory_space<vmem>>, %arg18: memref<8x32xf32, #tpu.memory_space<vmem>>) attributes {dimension_semantics = [#tpu.dimension_semantics<parallel>, #tpu.dimension_semantics<arbitrary>], iteration_bounds = array<i64: 2, 2>, scalar_prefetch = 0 : i64, scratch_operands = 2 : i64, tpu.core_type = #tpu.core_type<tc>, window_params = [{transform_indices = @transform_0, window_bounds = array<i64: 8, 8, 16>}, {pipeline_mode = #tpu.pipeline_mode<synchronous>, transform_indices = @transform_1, window_bounds = array<i64: 16, 128>}, {pipeline_mode = #tpu.pipeline_mode<synchronous>, transform_indices = @transform_2, window_bounds = array<i64: 32, 128>}, {pipeline_mode = #tpu.pipeline_mode<synchronous>, transform_indices = @transform_3, window_bounds = array<i64: 1, 128>}, {pipeline_mode = #tpu.pipeline_mode<synchronous>, transform_indices = @transform_4, window_bounds = array<i64: 16, 128>}, {pipeline_mode = #tpu.pipeline_mode<synchronous>, transform_indices = @transform_5, window_bounds = array<i64: 32, 128>}, {pipeline_mode = #tpu.pipeline_mode<synchronous>, transform_indices = @transform_6, window_bounds = array<i64: 1, 128>}, {transform_indices = @transform_7, window_bounds = array<i64: 8, 32>}, {transform_indices = @transform_8, window_bounds = array<i64: 8, 32>}, {transform_indices = @transform_9, window_bounds = array<i64: 8, 32>}, {transform_indices = @transform_10, window_bounds = array<i64: 8, 32>}, {pipeline_mode = #tpu.pipeline_mode<synchronous>, transform_indices = @transform_11, window_bounds = array<i64: 32, 16>}, {pipeline_mode = #tpu.pipeline_mode<synchronous>, transform_indices = @transform_12, window_bounds = array<i64: 32, 16>}, {pipeline_mode = #tpu.pipeline_mode<synchronous>, transform_indices = @transform_13, window_bounds = array<i64: 1, 16>}, {transform_indices = @transform_14, window_bounds = array<i64: 8, 16>}]} {
    %c0_i32 = arith.constant 0 : i32
    %0 = arith.cmpi eq, %arg1, %c0_i32 : i32
    %1 = arith.extui %0 : i1 to i32
    %c0_i32_0 = arith.constant 0 : i32
    %2 = arith.cmpi ne, %1, %c0_i32_0 : i32
    scf.if %2 {
      %c0_112 = arith.constant 0 : index
      %c0_113 = arith.constant 0 : index
      %297 = vector.load %arg9[%c0_112, %c0_113] : memref<8x32xf32, #tpu.memory_space<vmem>>, vector<8x32xf32>
      %c0_114 = arith.constant 0 : index
      %c0_115 = arith.constant 0 : index
      %298 = vector.load %arg17[%c0_114, %c0_115] : memref<8x32xf32, #tpu.memory_space<vmem>>, vector<8x32xf32>
      tpu.vector_store %arg17[%c0_114, %c0_115], %297 {strides = array<i32>} : memref<8x32xf32, #tpu.memory_space<vmem>>, vector<8x32xf32>,
      %c0_116 = arith.constant 0 : index
      %c0_117 = arith.constant 0 : index
      %299 = vector.load %arg10[%c0_116, %c0_117] : memref<8x32xf32, #tpu.memory_space<vmem>>, vector<8x32xf32>
      %c0_118 = arith.constant 0 : index
      %c0_119 = arith.constant 0 : index
      %300 = vector.load %arg18[%c0_118, %c0_119] : memref<8x32xf32, #tpu.memory_space<vmem>>, vector<8x32xf32>
      tpu.vector_store %arg18[%c0_118, %c0_119], %299 {strides = array<i32>} : memref<8x32xf32, #tpu.memory_space<vmem>>, vector<8x32xf32>,
    } else {
    }
    %c0 = arith.constant 0 : index
    %c0_1 = arith.constant 0 : index
    %c0_2 = arith.constant 0 : index
    %3 = vector.load %arg2[%c0, %c0_1, %c0_2] : memref<8x8x16xf32, #tpu.memory_space<vmem>>, vector<8x8x16xf32>
    %4 = vector.shape_cast %3 : vector<8x8x16xf32> to vector<64x16xf32>
    %c0_3 = arith.constant 0 : index
    %c0_4 = arith.constant 0 : index
    %5 = vector.load %arg3[%c0_3, %c0_4] : memref<16x128xf32, #tpu.memory_space<vmem>>, vector<16x128xf32>
    %cst = arith.constant dense<0.000000e+00> : vector<64x128xf32>
    %6 = tpu.matmul %4, %5, %cst {dimension_numbers = #tpu.dot_dimension_numbers<[1], [0], [0], [1], [0, 0, 1, 1], [], []>} : vector<64x16xf32>, vector<16x128xf32>, vector<64x128xf32> -> vector<64x128xf32>
    %c0_5 = arith.constant 0 : index
    %c0_6 = arith.constant 0 : index
    %7 = vector.load %arg5[%c0_5, %c0_6] : memref<1x128xf32, #tpu.memory_space<vmem>>, vector<1x128xf32>
    %8 = vector.broadcast %7 : vector<1x128xf32> to vector<64x128xf32>
    %9 = arith.addf %6, %8 : vector<64x128xf32>
    %c0_7 = arith.constant 0 : index
    %c0_8 = arith.constant 0 : index
    %10 = vector.load %arg17[%c0_7, %c0_8] : memref<8x32xf32, #tpu.memory_space<vmem>>, vector<8x32xf32>
    %c0_9 = arith.constant 0 : index
    %c0_10 = arith.constant 0 : index
    %11 = vector.load %arg18[%c0_9, %c0_10] : memref<8x32xf32, #tpu.memory_space<vmem>>, vector<8x32xf32>
    %12 = vector.extract_strided_slice %9 {offsets = [0, 0], sizes = [8, 128], strides = [1, 1]} : vector<64x128xf32> to vector<8x128xf32>
    %c0_11 = arith.constant 0 : index
    %c0_12 = arith.constant 0 : index
    %13 = vector.load %arg4[%c0_11, %c0_12] : memref<32x128xf32, #tpu.memory_space<vmem>>, vector<32x128xf32>
    %cst_13 = arith.constant dense<0.000000e+00> : vector<8x128xf32>
    %14 = tpu.matmul %10, %13, %cst_13 {dimension_numbers = #tpu.dot_dimension_numbers<[1], [0], [0], [1], [0, 0, 1, 1], [], []>} : vector<8x32xf32>, vector<32x128xf32>, vector<8x128xf32> -> vector<8x128xf32>
    %15 = arith.addf %12, %14 : vector<8x128xf32>
    %16 = vector.extract_strided_slice %15 {offsets = [0, 0], sizes = [8, 32], strides = [1, 1]} : vector<8x128xf32> to vector<8x32xf32>
    %cst_14 = arith.constant 5.000000e-01 : f32
    %17 = vector.broadcast %cst_14 : f32 to vector<8x32xf32>
    %18 = arith.mulf %17, %16 : vector<8x32xf32>
    %19 = math.tanh %18 : vector<8x32xf32>
    %cst_15 = arith.constant 1.000000e+00 : f32
    %20 = vector.broadcast %cst_15 : f32 to vector<8x32xf32>
    %21 = arith.addf %19, %20 : vector<8x32xf32>
    %cst_16 = arith.constant 5.000000e-01 : f32
    %22 = vector.broadcast %cst_16 : f32 to vector<8x32xf32>
    %23 = arith.mulf %22, %21 : vector<8x32xf32>
    %24 = vector.extract_strided_slice %15 {offsets = [0, 32], sizes = [8, 32], strides = [1, 1]} : vector<8x128xf32> to vector<8x32xf32>
    %cst_17 = arith.constant 5.000000e-01 : f32
    %25 = vector.broadcast %cst_17 : f32 to vector<8x32xf32>
    %26 = arith.mulf %25, %24 : vector<8x32xf32>
    %27 = math.tanh %26 : vector<8x32xf32>
    %cst_18 = arith.constant 1.000000e+00 : f32
    %28 = vector.broadcast %cst_18 : f32 to vector<8x32xf32>
    %29 = arith.addf %27, %28 : vector<8x32xf32>
    %cst_19 = arith.constant 5.000000e-01 : f32
    %30 = vector.broadcast %cst_19 : f32 to vector<8x32xf32>
    %31 = arith.mulf %30, %29 : vector<8x32xf32>
    %32 = vector.extract_strided_slice %15 {offsets = [0, 64], sizes = [8, 32], strides = [1, 1]} : vector<8x128xf32> to vector<8x32xf32>
    %33 = math.tanh %32 : vector<8x32xf32>
    %34 = vector.extract_strided_slice %15 {offsets = [0, 96], sizes = [8, 32], strides = [1, 1]} : vector<8x128xf32> to vector<8x32xf32>
    %cst_20 = arith.constant 5.000000e-01 : f32
    %35 = vector.broadcast %cst_20 : f32 to vector<8x32xf32>
    %36 = arith.mulf %35, %34 : vector<8x32xf32>
    %37 = math.tanh %36 : vector<8x32xf32>
    %cst_21 = arith.constant 1.000000e+00 : f32
    %38 = vector.broadcast %cst_21 : f32 to vector<8x32xf32>
    %39 = arith.addf %37, %38 : vector<8x32xf32>
    %cst_22 = arith.constant 5.000000e-01 : f32
    %40 = vector.broadcast %cst_22 : f32 to vector<8x32xf32>
    %41 = arith.mulf %40, %39 : vector<8x32xf32>
    %42 = arith.mulf %31, %11 : vector<8x32xf32>
    %43 = arith.mulf %23, %33 : vector<8x32xf32>
    %44 = arith.addf %42, %43 : vector<8x32xf32>
    %45 = math.tanh %44 : vector<8x32xf32>
    %46 = arith.mulf %41, %45 : vector<8x32xf32>
    %47 = vector.extract_strided_slice %9 {offsets = [8, 0], sizes = [8, 128], strides = [1, 1]} : vector<64x128xf32> to vector<8x128xf32>
    %c0_23 = arith.constant 0 : index
    %c0_24 = arith.constant 0 : index
    %48 = vector.load %arg4[%c0_23, %c0_24] : memref<32x128xf32, #tpu.memory_space<vmem>>, vector<32x128xf32>
    %cst_25 = arith.constant dense<0.000000e+00> : vector<8x128xf32>
    %49 = tpu.matmul %46, %48, %cst_25 {dimension_numbers = #tpu.dot_dimension_numbers<[1], [0], [0], [1], [0, 0, 1, 1], [], []>} : vector<8x32xf32>, vector<32x128xf32>, vector<8x128xf32> -> vector<8x128xf32>
    %50 = arith.addf %47, %49 : vector<8x128xf32>
    %51 = vector.extract_strided_slice %50 {offsets = [0, 0], sizes = [8, 32], strides = [1, 1]} : vector<8x128xf32> to vector<8x32xf32>
    %cst_26 = arith.constant 5.000000e-01 : f32
    %52 = vector.broadcast %cst_26 : f32 to vector<8x32xf32>
    %53 = arith.mulf %52, %51 : vector<8x32xf32>
    %54 = math.tanh %53 : vector<8x32xf32>
    %cst_27 = arith.constant 1.000000e+00 : f32
    %55 = vector.broadcast %cst_27 : f32 to vector<8x32xf32>
    %56 = arith.addf %54, %55 : vector<8x32xf32>
    %cst_28 = arith.constant 5.000000e-01 : f32
    %57 = vector.broadcast %cst_28 : f32 to vector<8x32xf32>
    %58 = arith.mulf %57, %56 : vector<8x32xf32>
    %59 = vector.extract_strided_slice %50 {offsets = [0, 32], sizes = [8, 32], strides = [1, 1]} : vector<8x128xf32> to vector<8x32xf32>
    %cst_29 = arith.constant 5.000000e-01 : f32
    %60 = vector.broadcast %cst_29 : f32 to vector<8x32xf32>
    %61 = arith.mulf %60, %59 : vector<8x32xf32>
    %62 = math.tanh %61 : vector<8x32xf32>
    %cst_30 = arith.constant 1.000000e+00 : f32
    %63 = vector.broadcast %cst_30 : f32 to vector<8x32xf32>
    %64 = arith.addf %62, %63 : vector<8x32xf32>
    %cst_31 = arith.constant 5.000000e-01 : f32
    %65 = vector.broadcast %cst_31 : f32 to vector<8x32xf32>
    %66 = arith.mulf %65, %64 : vector<8x32xf32>
    %67 = vector.extract_strided_slice %50 {offsets = [0, 64], sizes = [8, 32], strides = [1, 1]} : vector<8x128xf32> to vector<8x32xf32>
    %68 = math.tanh %67 : vector<8x32xf32>
    %69 = vector.extract_strided_slice %50 {offsets = [0, 96], sizes = [8, 32], strides = [1, 1]} : vector<8x128xf32> to vector<8x32xf32>
    %cst_32 = arith.constant 5.000000e-01 : f32
    %70 = vector.broadcast %cst_32 : f32 to vector<8x32xf32>
    %71 = arith.mulf %70, %69 : vector<8x32xf32>
    %72 = math.tanh %71 : vector<8x32xf32>
    %cst_33 = arith.constant 1.000000e+00 : f32
    %73 = vector.broadcast %cst_33 : f32 to vector<8x32xf32>
    %74 = arith.addf %72, %73 : vector<8x32xf32>
    %cst_34 = arith.constant 5.000000e-01 : f32
    %75 = vector.broadcast %cst_34 : f32 to vector<8x32xf32>
    %76 = arith.mulf %75, %74 : vector<8x32xf32>
    %77 = arith.mulf %66, %44 : vector<8x32xf32>
    %78 = arith.mulf %58, %68 : vector<8x32xf32>
    %79 = arith.addf %77, %78 : vector<8x32xf32>
    %80 = math.tanh %79 : vector<8x32xf32>
    %81 = arith.mulf %76, %80 : vector<8x32xf32>
    %82 = vector.extract_strided_slice %9 {offsets = [16, 0], sizes = [8, 128], strides = [1, 1]} : vector<64x128xf32> to vector<8x128xf32>
    %c0_35 = arith.constant 0 : index
    %c0_36 = arith.constant 0 : index
    %83 = vector.load %arg4[%c0_35, %c0_36] : memref<32x128xf32, #tpu.memory_space<vmem>>, vector<32x128xf32>
    %cst_37 = arith.constant dense<0.000000e+00> : vector<8x128xf32>
    %84 = tpu.matmul %81, %83, %cst_37 {dimension_numbers = #tpu.dot_dimension_numbers<[1], [0], [0], [1], [0, 0, 1, 1], [], []>} : vector<8x32xf32>, vector<32x128xf32>, vector<8x128xf32> -> vector<8x128xf32>
    %85 = arith.addf %82, %84 : vector<8x128xf32>
    %86 = vector.extract_strided_slice %85 {offsets = [0, 0], sizes = [8, 32], strides = [1, 1]} : vector<8x128xf32> to vector<8x32xf32>
    %cst_38 = arith.constant 5.000000e-01 : f32
    %87 = vector.broadcast %cst_38 : f32 to vector<8x32xf32>
    %88 = arith.mulf %87, %86 : vector<8x32xf32>
    %89 = math.tanh %88 : vector<8x32xf32>
    %cst_39 = arith.constant 1.000000e+00 : f32
    %90 = vector.broadcast %cst_39 : f32 to vector<8x32xf32>
    %91 = arith.addf %89, %90 : vector<8x32xf32>
    %cst_40 = arith.constant 5.000000e-01 : f32
    %92 = vector.broadcast %cst_40 : f32 to vector<8x32xf32>
    %93 = arith.mulf %92, %91 : vector<8x32xf32>
    %94 = vector.extract_strided_slice %85 {offsets = [0, 32], sizes = [8, 32], strides = [1, 1]} : vector<8x128xf32> to vector<8x32xf32>
    %cst_41 = arith.constant 5.000000e-01 : f32
    %95 = vector.broadcast %cst_41 : f32 to vector<8x32xf32>
    %96 = arith.mulf %95, %94 : vector<8x32xf32>
    %97 = math.tanh %96 : vector<8x32xf32>
    %cst_42 = arith.constant 1.000000e+00 : f32
    %98 = vector.broadcast %cst_42 : f32 to vector<8x32xf32>
    %99 = arith.addf %97, %98 : vector<8x32xf32>
    %cst_43 = arith.constant 5.000000e-01 : f32
    %100 = vector.broadcast %cst_43 : f32 to vector<8x32xf32>
    %101 = arith.mulf %100, %99 : vector<8x32xf32>
    %102 = vector.extract_strided_slice %85 {offsets = [0, 64], sizes = [8, 32], strides = [1, 1]} : vector<8x128xf32> to vector<8x32xf32>
    %103 = math.tanh %102 : vector<8x32xf32>
    %104 = vector.extract_strided_slice %85 {offsets = [0, 96], sizes = [8, 32], strides = [1, 1]} : vector<8x128xf32> to vector<8x32xf32>
    %cst_44 = arith.constant 5.000000e-01 : f32
    %105 = vector.broadcast %cst_44 : f32 to vector<8x32xf32>
    %106 = arith.mulf %105, %104 : vector<8x32xf32>
    %107 = math.tanh %106 : vector<8x32xf32>
    %cst_45 = arith.constant 1.000000e+00 : f32
    %108 = vector.broadcast %cst_45 : f32 to vector<8x32xf32>
    %109 = arith.addf %107, %108 : vector<8x32xf32>
    %cst_46 = arith.constant 5.000000e-01 : f32
    %110 = vector.broadcast %cst_46 : f32 to vector<8x32xf32>
    %111 = arith.mulf %110, %109 : vector<8x32xf32>
    %112 = arith.mulf %101, %79 : vector<8x32xf32>
    %113 = arith.mulf %93, %103 : vector<8x32xf32>
    %114 = arith.addf %112, %113 : vector<8x32xf32>
    %115 = math.tanh %114 : vector<8x32xf32>
    %116 = arith.mulf %111, %115 : vector<8x32xf32>
    %117 = vector.extract_strided_slice %9 {offsets = [24, 0], sizes = [8, 128], strides = [1, 1]} : vector<64x128xf32> to vector<8x128xf32>
    %c0_47 = arith.constant 0 : index
    %c0_48 = arith.constant 0 : index
    %118 = vector.load %arg4[%c0_47, %c0_48] : memref<32x128xf32, #tpu.memory_space<vmem>>, vector<32x128xf32>
    %cst_49 = arith.constant dense<0.000000e+00> : vector<8x128xf32>
    %119 = tpu.matmul %116, %118, %cst_49 {dimension_numbers = #tpu.dot_dimension_numbers<[1], [0], [0], [1], [0, 0, 1, 1], [], []>} : vector<8x32xf32>, vector<32x128xf32>, vector<8x128xf32> -> vector<8x128xf32>
    %120 = arith.addf %117, %119 : vector<8x128xf32>
    %121 = vector.extract_strided_slice %120 {offsets = [0, 0], sizes = [8, 32], strides = [1, 1]} : vector<8x128xf32> to vector<8x32xf32>
    %cst_50 = arith.constant 5.000000e-01 : f32
    %122 = vector.broadcast %cst_50 : f32 to vector<8x32xf32>
    %123 = arith.mulf %122, %121 : vector<8x32xf32>
    %124 = math.tanh %123 : vector<8x32xf32>
    %cst_51 = arith.constant 1.000000e+00 : f32
    %125 = vector.broadcast %cst_51 : f32 to vector<8x32xf32>
    %126 = arith.addf %124, %125 : vector<8x32xf32>
    %cst_52 = arith.constant 5.000000e-01 : f32
    %127 = vector.broadcast %cst_52 : f32 to vector<8x32xf32>
    %128 = arith.mulf %127, %126 : vector<8x32xf32>
    %129 = vector.extract_strided_slice %120 {offsets = [0, 32], sizes = [8, 32], strides = [1, 1]} : vector<8x128xf32> to vector<8x32xf32>
    %cst_53 = arith.constant 5.000000e-01 : f32
    %130 = vector.broadcast %cst_53 : f32 to vector<8x32xf32>
    %131 = arith.mulf %130, %129 : vector<8x32xf32>
    %132 = math.tanh %131 : vector<8x32xf32>
    %cst_54 = arith.constant 1.000000e+00 : f32
    %133 = vector.broadcast %cst_54 : f32 to vector<8x32xf32>
    %134 = arith.addf %132, %133 : vector<8x32xf32>
    %cst_55 = arith.constant 5.000000e-01 : f32
    %135 = vector.broadcast %cst_55 : f32 to vector<8x32xf32>
    %136 = arith.mulf %135, %134 : vector<8x32xf32>
    %137 = vector.extract_strided_slice %120 {offsets = [0, 64], sizes = [8, 32], strides = [1, 1]} : vector<8x128xf32> to vector<8x32xf32>
    %138 = math.tanh %137 : vector<8x32xf32>
    %139 = vector.extract_strided_slice %120 {offsets = [0, 96], sizes = [8, 32], strides = [1, 1]} : vector<8x128xf32> to vector<8x32xf32>
    %cst_56 = arith.constant 5.000000e-01 : f32
    %140 = vector.broadcast %cst_56 : f32 to vector<8x32xf32>
    %141 = arith.mulf %140, %139 : vector<8x32xf32>
    %142 = math.tanh %141 : vector<8x32xf32>
    %cst_57 = arith.constant 1.000000e+00 : f32
    %143 = vector.broadcast %cst_57 : f32 to vector<8x32xf32>
    %144 = arith.addf %142, %143 : vector<8x32xf32>
    %cst_58 = arith.constant 5.000000e-01 : f32
    %145 = vector.broadcast %cst_58 : f32 to vector<8x32xf32>
    %146 = arith.mulf %145, %144 : vector<8x32xf32>
    %147 = arith.mulf %136, %114 : vector<8x32xf32>
    %148 = arith.mulf %128, %138 : vector<8x32xf32>
    %149 = arith.addf %147, %148 : vector<8x32xf32>
    %150 = math.tanh %149 : vector<8x32xf32>
    %151 = arith.mulf %146, %150 : vector<8x32xf32>
    %152 = vector.extract_strided_slice %9 {offsets = [32, 0], sizes = [8, 128], strides = [1, 1]} : vector<64x128xf32> to vector<8x128xf32>
    %c0_59 = arith.constant 0 : index
    %c0_60 = arith.constant 0 : index
    %153 = vector.load %arg4[%c0_59, %c0_60] : memref<32x128xf32, #tpu.memory_space<vmem>>, vector<32x128xf32>
    %cst_61 = arith.constant dense<0.000000e+00> : vector<8x128xf32>
    %154 = tpu.matmul %151, %153, %cst_61 {dimension_numbers = #tpu.dot_dimension_numbers<[1], [0], [0], [1], [0, 0, 1, 1], [], []>} : vector<8x32xf32>, vector<32x128xf32>, vector<8x128xf32> -> vector<8x128xf32>
    %155 = arith.addf %152, %154 : vector<8x128xf32>
    %156 = vector.extract_strided_slice %155 {offsets = [0, 0], sizes = [8, 32], strides = [1, 1]} : vector<8x128xf32> to vector<8x32xf32>
    %cst_62 = arith.constant 5.000000e-01 : f32
    %157 = vector.broadcast %cst_62 : f32 to vector<8x32xf32>
    %158 = arith.mulf %157, %156 : vector<8x32xf32>
    %159 = math.tanh %158 : vector<8x32xf32>
    %cst_63 = arith.constant 1.000000e+00 : f32
    %160 = vector.broadcast %cst_63 : f32 to vector<8x32xf32>
    %161 = arith.addf %159, %160 : vector<8x32xf32>
    %cst_64 = arith.constant 5.000000e-01 : f32
    %162 = vector.broadcast %cst_64 : f32 to vector<8x32xf32>
    %163 = arith.mulf %162, %161 : vector<8x32xf32>
    %164 = vector.extract_strided_slice %155 {offsets = [0, 32], sizes = [8, 32], strides = [1, 1]} : vector<8x128xf32> to vector<8x32xf32>
    %cst_65 = arith.constant 5.000000e-01 : f32
    %165 = vector.broadcast %cst_65 : f32 to vector<8x32xf32>
    %166 = arith.mulf %165, %164 : vector<8x32xf32>
    %167 = math.tanh %166 : vector<8x32xf32>
    %cst_66 = arith.constant 1.000000e+00 : f32
    %168 = vector.broadcast %cst_66 : f32 to vector<8x32xf32>
    %169 = arith.addf %167, %168 : vector<8x32xf32>
    %cst_67 = arith.constant 5.000000e-01 : f32
    %170 = vector.broadcast %cst_67 : f32 to vector<8x32xf32>
    %171 = arith.mulf %170, %169 : vector<8x32xf32>
    %172 = vector.extract_strided_slice %155 {offsets = [0, 64], sizes = [8, 32], strides = [1, 1]} : vector<8x128xf32> to vector<8x32xf32>
    %173 = math.tanh %172 : vector<8x32xf32>
    %174 = vector.extract_strided_slice %155 {offsets = [0, 96], sizes = [8, 32], strides = [1, 1]} : vector<8x128xf32> to vector<8x32xf32>
    %cst_68 = arith.constant 5.000000e-01 : f32
    %175 = vector.broadcast %cst_68 : f32 to vector<8x32xf32>
    %176 = arith.mulf %175, %174 : vector<8x32xf32>
    %177 = math.tanh %176 : vector<8x32xf32>
    %cst_69 = arith.constant 1.000000e+00 : f32
    %178 = vector.broadcast %cst_69 : f32 to vector<8x32xf32>
    %179 = arith.addf %177, %178 : vector<8x32xf32>
    %cst_70 = arith.constant 5.000000e-01 : f32
    %180 = vector.broadcast %cst_70 : f32 to vector<8x32xf32>
    %181 = arith.mulf %180, %179 : vector<8x32xf32>
    %182 = arith.mulf %171, %149 : vector<8x32xf32>
    %183 = arith.mulf %163, %173 : vector<8x32xf32>
    %184 = arith.addf %182, %183 : vector<8x32xf32>
    %185 = math.tanh %184 : vector<8x32xf32>
    %186 = arith.mulf %181, %185 : vector<8x32xf32>
    %187 = vector.extract_strided_slice %9 {offsets = [40, 0], sizes = [8, 128], strides = [1, 1]} : vector<64x128xf32> to vector<8x128xf32>
    %c0_71 = arith.constant 0 : index
    %c0_72 = arith.constant 0 : index
    %188 = vector.load %arg4[%c0_71, %c0_72] : memref<32x128xf32, #tpu.memory_space<vmem>>, vector<32x128xf32>
    %cst_73 = arith.constant dense<0.000000e+00> : vector<8x128xf32>
    %189 = tpu.matmul %186, %188, %cst_73 {dimension_numbers = #tpu.dot_dimension_numbers<[1], [0], [0], [1], [0, 0, 1, 1], [], []>} : vector<8x32xf32>, vector<32x128xf32>, vector<8x128xf32> -> vector<8x128xf32>
    %190 = arith.addf %187, %189 : vector<8x128xf32>
    %191 = vector.extract_strided_slice %190 {offsets = [0, 0], sizes = [8, 32], strides = [1, 1]} : vector<8x128xf32> to vector<8x32xf32>
    %cst_74 = arith.constant 5.000000e-01 : f32
    %192 = vector.broadcast %cst_74 : f32 to vector<8x32xf32>
    %193 = arith.mulf %192, %191 : vector<8x32xf32>
    %194 = math.tanh %193 : vector<8x32xf32>
    %cst_75 = arith.constant 1.000000e+00 : f32
    %195 = vector.broadcast %cst_75 : f32 to vector<8x32xf32>
    %196 = arith.addf %194, %195 : vector<8x32xf32>
    %cst_76 = arith.constant 5.000000e-01 : f32
    %197 = vector.broadcast %cst_76 : f32 to vector<8x32xf32>
    %198 = arith.mulf %197, %196 : vector<8x32xf32>
    %199 = vector.extract_strided_slice %190 {offsets = [0, 32], sizes = [8, 32], strides = [1, 1]} : vector<8x128xf32> to vector<8x32xf32>
    %cst_77 = arith.constant 5.000000e-01 : f32
    %200 = vector.broadcast %cst_77 : f32 to vector<8x32xf32>
    %201 = arith.mulf %200, %199 : vector<8x32xf32>
    %202 = math.tanh %201 : vector<8x32xf32>
    %cst_78 = arith.constant 1.000000e+00 : f32
    %203 = vector.broadcast %cst_78 : f32 to vector<8x32xf32>
    %204 = arith.addf %202, %203 : vector<8x32xf32>
    %cst_79 = arith.constant 5.000000e-01 : f32
    %205 = vector.broadcast %cst_79 : f32 to vector<8x32xf32>
    %206 = arith.mulf %205, %204 : vector<8x32xf32>
    %207 = vector.extract_strided_slice %190 {offsets = [0, 64], sizes = [8, 32], strides = [1, 1]} : vector<8x128xf32> to vector<8x32xf32>
    %208 = math.tanh %207 : vector<8x32xf32>
    %209 = vector.extract_strided_slice %190 {offsets = [0, 96], sizes = [8, 32], strides = [1, 1]} : vector<8x128xf32> to vector<8x32xf32>
    %cst_80 = arith.constant 5.000000e-01 : f32
    %210 = vector.broadcast %cst_80 : f32 to vector<8x32xf32>
    %211 = arith.mulf %210, %209 : vector<8x32xf32>
    %212 = math.tanh %211 : vector<8x32xf32>
    %cst_81 = arith.constant 1.000000e+00 : f32
    %213 = vector.broadcast %cst_81 : f32 to vector<8x32xf32>
    %214 = arith.addf %212, %213 : vector<8x32xf32>
    %cst_82 = arith.constant 5.000000e-01 : f32
    %215 = vector.broadcast %cst_82 : f32 to vector<8x32xf32>
    %216 = arith.mulf %215, %214 : vector<8x32xf32>
    %217 = arith.mulf %206, %184 : vector<8x32xf32>
    %218 = arith.mulf %198, %208 : vector<8x32xf32>
    %219 = arith.addf %217, %218 : vector<8x32xf32>
    %220 = math.tanh %219 : vector<8x32xf32>
    %221 = arith.mulf %216, %220 : vector<8x32xf32>
    %222 = vector.extract_strided_slice %9 {offsets = [48, 0], sizes = [8, 128], strides = [1, 1]} : vector<64x128xf32> to vector<8x128xf32>
    %c0_83 = arith.constant 0 : index
    %c0_84 = arith.constant 0 : index
    %223 = vector.load %arg4[%c0_83, %c0_84] : memref<32x128xf32, #tpu.memory_space<vmem>>, vector<32x128xf32>
    %cst_85 = arith.constant dense<0.000000e+00> : vector<8x128xf32>
    %224 = tpu.matmul %221, %223, %cst_85 {dimension_numbers = #tpu.dot_dimension_numbers<[1], [0], [0], [1], [0, 0, 1, 1], [], []>} : vector<8x32xf32>, vector<32x128xf32>, vector<8x128xf32> -> vector<8x128xf32>
    %225 = arith.addf %222, %224 : vector<8x128xf32>
    %226 = vector.extract_strided_slice %225 {offsets = [0, 0], sizes = [8, 32], strides = [1, 1]} : vector<8x128xf32> to vector<8x32xf32>
    %cst_86 = arith.constant 5.000000e-01 : f32
    %227 = vector.broadcast %cst_86 : f32 to vector<8x32xf32>
    %228 = arith.mulf %227, %226 : vector<8x32xf32>
    %229 = math.tanh %228 : vector<8x32xf32>
    %cst_87 = arith.constant 1.000000e+00 : f32
    %230 = vector.broadcast %cst_87 : f32 to vector<8x32xf32>
    %231 = arith.addf %229, %230 : vector<8x32xf32>
    %cst_88 = arith.constant 5.000000e-01 : f32
    %232 = vector.broadcast %cst_88 : f32 to vector<8x32xf32>
    %233 = arith.mulf %232, %231 : vector<8x32xf32>
    %234 = vector.extract_strided_slice %225 {offsets = [0, 32], sizes = [8, 32], strides = [1, 1]} : vector<8x128xf32> to vector<8x32xf32>
    %cst_89 = arith.constant 5.000000e-01 : f32
    %235 = vector.broadcast %cst_89 : f32 to vector<8x32xf32>
    %236 = arith.mulf %235, %234 : vector<8x32xf32>
    %237 = math.tanh %236 : vector<8x32xf32>
    %cst_90 = arith.constant 1.000000e+00 : f32
    %238 = vector.broadcast %cst_90 : f32 to vector<8x32xf32>
    %239 = arith.addf %237, %238 : vector<8x32xf32>
    %cst_91 = arith.constant 5.000000e-01 : f32
    %240 = vector.broadcast %cst_91 : f32 to vector<8x32xf32>
    %241 = arith.mulf %240, %239 : vector<8x32xf32>
    %242 = vector.extract_strided_slice %225 {offsets = [0, 64], sizes = [8, 32], strides = [1, 1]} : vector<8x128xf32> to vector<8x32xf32>
    %243 = math.tanh %242 : vector<8x32xf32>
    %244 = vector.extract_strided_slice %225 {offsets = [0, 96], sizes = [8, 32], strides = [1, 1]} : vector<8x128xf32> to vector<8x32xf32>
    %cst_92 = arith.constant 5.000000e-01 : f32
    %245 = vector.broadcast %cst_92 : f32 to vector<8x32xf32>
    %246 = arith.mulf %245, %244 : vector<8x32xf32>
    %247 = math.tanh %246 : vector<8x32xf32>
    %cst_93 = arith.constant 1.000000e+00 : f32
    %248 = vector.broadcast %cst_93 : f32 to vector<8x32xf32>
    %249 = arith.addf %247, %248 : vector<8x32xf32>
    %cst_94 = arith.constant 5.000000e-01 : f32
    %250 = vector.broadcast %cst_94 : f32 to vector<8x32xf32>
    %251 = arith.mulf %250, %249 : vector<8x32xf32>
    %252 = arith.mulf %241, %219 : vector<8x32xf32>
    %253 = arith.mulf %233, %243 : vector<8x32xf32>
    %254 = arith.addf %252, %253 : vector<8x32xf32>
    %255 = math.tanh %254 : vector<8x32xf32>
    %256 = arith.mulf %251, %255 : vector<8x32xf32>
    %257 = vector.extract_strided_slice %9 {offsets = [56, 0], sizes = [8, 128], strides = [1, 1]} : vector<64x128xf32> to vector<8x128xf32>
    %c0_95 = arith.constant 0 : index
    %c0_96 = arith.constant 0 : index
    %258 = vector.load %arg4[%c0_95, %c0_96] : memref<32x128xf32, #tpu.memory_space<vmem>>, vector<32x128xf32>
    %cst_97 = arith.constant dense<0.000000e+00> : vector<8x128xf32>
    %259 = tpu.matmul %256, %258, %cst_97 {dimension_numbers = #tpu.dot_dimension_numbers<[1], [0], [0], [1], [0, 0, 1, 1], [], []>} : vector<8x32xf32>, vector<32x128xf32>, vector<8x128xf32> -> vector<8x128xf32>
    %260 = arith.addf %257, %259 : vector<8x128xf32>
    %261 = vector.extract_strided_slice %260 {offsets = [0, 0], sizes = [8, 32], strides = [1, 1]} : vector<8x128xf32> to vector<8x32xf32>
    %cst_98 = arith.constant 5.000000e-01 : f32
    %262 = vector.broadcast %cst_98 : f32 to vector<8x32xf32>
    %263 = arith.mulf %262, %261 : vector<8x32xf32>
    %264 = math.tanh %263 : vector<8x32xf32>
    %cst_99 = arith.constant 1.000000e+00 : f32
    %265 = vector.broadcast %cst_99 : f32 to vector<8x32xf32>
    %266 = arith.addf %264, %265 : vector<8x32xf32>
    %cst_100 = arith.constant 5.000000e-01 : f32
    %267 = vector.broadcast %cst_100 : f32 to vector<8x32xf32>
    %268 = arith.mulf %267, %266 : vector<8x32xf32>
    %269 = vector.extract_strided_slice %260 {offsets = [0, 32], sizes = [8, 32], strides = [1, 1]} : vector<8x128xf32> to vector<8x32xf32>
    %cst_101 = arith.constant 5.000000e-01 : f32
    %270 = vector.broadcast %cst_101 : f32 to vector<8x32xf32>
    %271 = arith.mulf %270, %269 : vector<8x32xf32>
    %272 = math.tanh %271 : vector<8x32xf32>
    %cst_102 = arith.constant 1.000000e+00 : f32
    %273 = vector.broadcast %cst_102 : f32 to vector<8x32xf32>
    %274 = arith.addf %272, %273 : vector<8x32xf32>
    %cst_103 = arith.constant 5.000000e-01 : f32
    %275 = vector.broadcast %cst_103 : f32 to vector<8x32xf32>
    %276 = arith.mulf %275, %274 : vector<8x32xf32>
    %277 = vector.extract_strided_slice %260 {offsets = [0, 64], sizes = [8, 32], strides = [1, 1]} : vector<8x128xf32> to vector<8x32xf32>
    %278 = math.tanh %277 : vector<8x32xf32>
    %279 = vector.extract_strided_slice %260 {offsets = [0, 96], sizes = [8, 32], strides = [1, 1]} : vector<8x128xf32> to vector<8x32xf32>
    %cst_104 = arith.constant 5.000000e-01 : f32
    %280 = vector.broadcast %cst_104 : f32 to vector<8x32xf32>
    %281 = arith.mulf %280, %279 : vector<8x32xf32>
    %282 = math.tanh %281 : vector<8x32xf32>
    %cst_105 = arith.constant 1.000000e+00 : f32
    %283 = vector.broadcast %cst_105 : f32 to vector<8x32xf32>
    %284 = arith.addf %282, %283 : vector<8x32xf32>
    %cst_106 = arith.constant 5.000000e-01 : f32
    %285 = vector.broadcast %cst_106 : f32 to vector<8x32xf32>
    %286 = arith.mulf %285, %284 : vector<8x32xf32>
    %287 = arith.mulf %276, %254 : vector<8x32xf32>
    %288 = arith.mulf %268, %278 : vector<8x32xf32>
    %289 = arith.addf %287, %288 : vector<8x32xf32>
    %290 = math.tanh %289 : vector<8x32xf32>
    %291 = arith.mulf %286, %290 : vector<8x32xf32>
    %c0_107 = arith.constant 0 : index
    %c0_108 = arith.constant 0 : index
    %292 = vector.load %arg17[%c0_107, %c0_108] : memref<8x32xf32, #tpu.memory_space<vmem>>, vector<8x32xf32>
    tpu.vector_store %arg17[%c0_107, %c0_108], %291 {strides = array<i32>} : memref<8x32xf32, #tpu.memory_space<vmem>>, vector<8x32xf32>,
    %c0_109 = arith.constant 0 : index
    %c0_110 = arith.constant 0 : index
    %293 = vector.load %arg18[%c0_109, %c0_110] : memref<8x32xf32, #tpu.memory_space<vmem>>, vector<8x32xf32>
    tpu.vector_store %arg18[%c0_109, %c0_110], %289 {strides = array<i32>} : memref<8x32xf32, #tpu.memory_space<vmem>>, vector<8x32xf32>,
    %c1_i32 = arith.constant 1 : i32
    %294 = arith.cmpi eq, %arg1, %c1_i32 : i32
    %295 = arith.extui %294 : i1 to i32
    %c0_i32_111 = arith.constant 0 : i32
    %296 = arith.cmpi ne, %295, %c0_i32_111 : i32
    scf.if %296 {
      %c7 = arith.constant 7 : index
      %c0_112 = arith.constant 0 : index
      %c0_113 = arith.constant 0 : index
      %297 = vector.load %arg2[%c7, %c0_112, %c0_113] : memref<8x8x16xf32, #tpu.memory_space<vmem>>, vector<1x8x16xf32>
      %298 = vector.shape_cast %297 : vector<1x8x16xf32> to vector<8x16xf32>
      %c0_114 = arith.constant 0 : index
      %c0_115 = arith.constant 0 : index
      %299 = vector.load %arg6[%c0_114, %c0_115] : memref<16x128xf32, #tpu.memory_space<vmem>>, vector<16x128xf32>
      %cst_116 = arith.constant dense<0.000000e+00> : vector<8x128xf32>
      %300 = tpu.matmul %298, %299, %cst_116 {dimension_numbers = #tpu.dot_dimension_numbers<[1], [0], [0], [1], [0, 0, 1, 1], [], []>} : vector<8x16xf32>, vector<16x128xf32>, vector<8x128xf32> -> vector<8x128xf32>
      %c0_117 = arith.constant 0 : index
      %c0_118 = arith.constant 0 : index
      %301 = vector.load %arg8[%c0_117, %c0_118] : memref<1x128xf32, #tpu.memory_space<vmem>>, vector<1x128xf32>
      %302 = vector.broadcast %301 : vector<1x128xf32> to vector<8x128xf32>
      %303 = arith.addf %300, %302 : vector<8x128xf32>
      %c0_119 = arith.constant 0 : index
      %c0_120 = arith.constant 0 : index
      %304 = vector.load %arg11[%c0_119, %c0_120] : memref<8x32xf32, #tpu.memory_space<vmem>>, vector<8x32xf32>
      %c0_121 = arith.constant 0 : index
      %c0_122 = arith.constant 0 : index
      %305 = vector.load %arg12[%c0_121, %c0_122] : memref<8x32xf32, #tpu.memory_space<vmem>>, vector<8x32xf32>
      %c0_123 = arith.constant 0 : index
      %c0_124 = arith.constant 0 : index
      %306 = vector.load %arg7[%c0_123, %c0_124] : memref<32x128xf32, #tpu.memory_space<vmem>>, vector<32x128xf32>
      %cst_125 = arith.constant dense<0.000000e+00> : vector<8x128xf32>
      %307 = tpu.matmul %304, %306, %cst_125 {dimension_numbers = #tpu.dot_dimension_numbers<[1], [0], [0], [1], [0, 0, 1, 1], [], []>} : vector<8x32xf32>, vector<32x128xf32>, vector<8x128xf32> -> vector<8x128xf32>
      %308 = arith.addf %303, %307 : vector<8x128xf32>
      %309 = vector.extract_strided_slice %308 {offsets = [0, 0], sizes = [8, 32], strides = [1, 1]} : vector<8x128xf32> to vector<8x32xf32>
      %cst_126 = arith.constant 5.000000e-01 : f32
      %310 = vector.broadcast %cst_126 : f32 to vector<8x32xf32>
      %311 = arith.mulf %310, %309 : vector<8x32xf32>
      %312 = math.tanh %311 : vector<8x32xf32>
      %cst_127 = arith.constant 1.000000e+00 : f32
      %313 = vector.broadcast %cst_127 : f32 to vector<8x32xf32>
      %314 = arith.addf %312, %313 : vector<8x32xf32>
      %cst_128 = arith.constant 5.000000e-01 : f32
      %315 = vector.broadcast %cst_128 : f32 to vector<8x32xf32>
      %316 = arith.mulf %315, %314 : vector<8x32xf32>
      %317 = vector.extract_strided_slice %308 {offsets = [0, 32], sizes = [8, 32], strides = [1, 1]} : vector<8x128xf32> to vector<8x32xf32>
      %cst_129 = arith.constant 5.000000e-01 : f32
      %318 = vector.broadcast %cst_129 : f32 to vector<8x32xf32>
      %319 = arith.mulf %318, %317 : vector<8x32xf32>
      %320 = math.tanh %319 : vector<8x32xf32>
      %cst_130 = arith.constant 1.000000e+00 : f32
      %321 = vector.broadcast %cst_130 : f32 to vector<8x32xf32>
      %322 = arith.addf %320, %321 : vector<8x32xf32>
      %cst_131 = arith.constant 5.000000e-01 : f32
      %323 = vector.broadcast %cst_131 : f32 to vector<8x32xf32>
      %324 = arith.mulf %323, %322 : vector<8x32xf32>
      %325 = vector.extract_strided_slice %308 {offsets = [0, 64], sizes = [8, 32], strides = [1, 1]} : vector<8x128xf32> to vector<8x32xf32>
      %326 = math.tanh %325 : vector<8x32xf32>
      %327 = vector.extract_strided_slice %308 {offsets = [0, 96], sizes = [8, 32], strides = [1, 1]} : vector<8x128xf32> to vector<8x32xf32>
      %cst_132 = arith.constant 5.000000e-01 : f32
      %328 = vector.broadcast %cst_132 : f32 to vector<8x32xf32>
      %329 = arith.mulf %328, %327 : vector<8x32xf32>
      %330 = math.tanh %329 : vector<8x32xf32>
      %cst_133 = arith.constant 1.000000e+00 : f32
      %331 = vector.broadcast %cst_133 : f32 to vector<8x32xf32>
      %332 = arith.addf %330, %331 : vector<8x32xf32>
      %cst_134 = arith.constant 5.000000e-01 : f32
      %333 = vector.broadcast %cst_134 : f32 to vector<8x32xf32>
      %334 = arith.mulf %333, %332 : vector<8x32xf32>
      %335 = arith.mulf %324, %305 : vector<8x32xf32>
      %336 = arith.mulf %316, %326 : vector<8x32xf32>
      %337 = arith.addf %335, %336 : vector<8x32xf32>
      %338 = math.tanh %337 : vector<8x32xf32>
      %339 = arith.mulf %334, %338 : vector<8x32xf32>
      %c0_135 = arith.constant 0 : index
      %c0_136 = arith.constant 0 : index
      %340 = vector.load %arg13[%c0_135, %c0_136] : memref<32x16xf32, #tpu.memory_space<vmem>>, vector<32x16xf32>
      %cst_137 = arith.constant dense<0.000000e+00> : vector<8x16xf32>
      %341 = tpu.matmul %291, %340, %cst_137 {dimension_numbers = #tpu.dot_dimension_numbers<[1], [0], [0], [1], [0, 0, 1, 1], [], []>} : vector<8x32xf32>, vector<32x16xf32>, vector<8x16xf32> -> vector<8x16xf32>
      %c0_138 = arith.constant 0 : index
      %c0_139 = arith.constant 0 : index
      %342 = vector.load %arg14[%c0_138, %c0_139] : memref<32x16xf32, #tpu.memory_space<vmem>>, vector<32x16xf32>
      %cst_140 = arith.constant dense<0.000000e+00> : vector<8x16xf32>
      %343 = tpu.matmul %339, %342, %cst_140 {dimension_numbers = #tpu.dot_dimension_numbers<[1], [0], [0], [1], [0, 0, 1, 1], [], []>} : vector<8x32xf32>, vector<32x16xf32>, vector<8x16xf32> -> vector<8x16xf32>
      %344 = arith.addf %341, %343 : vector<8x16xf32>
      %c0_141 = arith.constant 0 : index
      %c0_142 = arith.constant 0 : index
      %345 = vector.load %arg15[%c0_141, %c0_142] : memref<1x16xf32, #tpu.memory_space<vmem>>, vector<1x16xf32>
      %346 = vector.broadcast %345 : vector<1x16xf32> to vector<8x16xf32>
      %347 = arith.addf %344, %346 : vector<8x16xf32>
      %c0_143 = arith.constant 0 : index
      %c0_144 = arith.constant 0 : index
      %348 = vector.load %arg16[%c0_143, %c0_144] : memref<8x16xf32, #tpu.memory_space<vmem>>, vector<8x16xf32>
      tpu.vector_store %arg16[%c0_143, %c0_144], %347 {strides = array<i32>} : memref<8x16xf32, #tpu.memory_space<vmem>>, vector<8x16xf32>,
    } else {
    }
    return
  }
  func.func @transform_0(%arg0: i32, %arg1: i32) -> (i32, i32, i32) {
    %c0_i32 = arith.constant 0 : i32
    %c0_i32_0 = arith.constant 0 : i32
    return %arg1, %arg0, %c0_i32 : i32, i32, i32
  }
  func.func @transform_1(%arg0: i32, %arg1: i32) -> (i32, i32) {
    %c0_i32 = arith.constant 0 : i32
    %c0_i32_0 = arith.constant 0 : i32
    %c0_i32_1 = arith.constant 0 : i32
    return %c0_i32, %c0_i32_0 : i32, i32
  }
  func.func @transform_2(%arg0: i32, %arg1: i32) -> (i32, i32) {
    %c0_i32 = arith.constant 0 : i32
    %c0_i32_0 = arith.constant 0 : i32
    %c0_i32_1 = arith.constant 0 : i32
    return %c0_i32, %c0_i32_0 : i32, i32
  }
  func.func @transform_3(%arg0: i32, %arg1: i32) -> (i32, i32) {
    %c0_i32 = arith.constant 0 : i32
    %c0_i32_0 = arith.constant 0 : i32
    %c0_i32_1 = arith.constant 0 : i32
    return %c0_i32, %c0_i32_0 : i32, i32
  }
  func.func @transform_4(%arg0: i32, %arg1: i32) -> (i32, i32) {
    %c0_i32 = arith.constant 0 : i32
    %c0_i32_0 = arith.constant 0 : i32
    %c0_i32_1 = arith.constant 0 : i32
    return %c0_i32, %c0_i32_0 : i32, i32
  }
  func.func @transform_5(%arg0: i32, %arg1: i32) -> (i32, i32) {
    %c0_i32 = arith.constant 0 : i32
    %c0_i32_0 = arith.constant 0 : i32
    %c0_i32_1 = arith.constant 0 : i32
    return %c0_i32, %c0_i32_0 : i32, i32
  }
  func.func @transform_6(%arg0: i32, %arg1: i32) -> (i32, i32) {
    %c0_i32 = arith.constant 0 : i32
    %c0_i32_0 = arith.constant 0 : i32
    %c0_i32_1 = arith.constant 0 : i32
    return %c0_i32, %c0_i32_0 : i32, i32
  }
  func.func @transform_7(%arg0: i32, %arg1: i32) -> (i32, i32) {
    %c0_i32 = arith.constant 0 : i32
    %c0_i32_0 = arith.constant 0 : i32
    return %arg0, %c0_i32 : i32, i32
  }
  func.func @transform_8(%arg0: i32, %arg1: i32) -> (i32, i32) {
    %c0_i32 = arith.constant 0 : i32
    %c0_i32_0 = arith.constant 0 : i32
    return %arg0, %c0_i32 : i32, i32
  }
  func.func @transform_9(%arg0: i32, %arg1: i32) -> (i32, i32) {
    %c0_i32 = arith.constant 0 : i32
    %c0_i32_0 = arith.constant 0 : i32
    return %arg0, %c0_i32 : i32, i32
  }
  func.func @transform_10(%arg0: i32, %arg1: i32) -> (i32, i32) {
    %c0_i32 = arith.constant 0 : i32
    %c0_i32_0 = arith.constant 0 : i32
    return %arg0, %c0_i32 : i32, i32
  }
  func.func @transform_11(%arg0: i32, %arg1: i32) -> (i32, i32) {
    %c0_i32 = arith.constant 0 : i32
    %c0_i32_0 = arith.constant 0 : i32
    %c0_i32_1 = arith.constant 0 : i32
    return %c0_i32, %c0_i32_0 : i32, i32
  }
  func.func @transform_12(%arg0: i32, %arg1: i32) -> (i32, i32) {
    %c0_i32 = arith.constant 0 : i32
    %c0_i32_0 = arith.constant 0 : i32
    %c0_i32_1 = arith.constant 0 : i32
    return %c0_i32, %c0_i32_0 : i32, i32
  }
  func.func @transform_13(%arg0: i32, %arg1: i32) -> (i32, i32) {
    %c0_i32 = arith.constant 0 : i32
    %c0_i32_0 = arith.constant 0 : i32
    %c0_i32_1 = arith.constant 0 : i32
    return %c0_i32, %c0_i32_0 : i32, i32
  }
  func.func @transform_14(%arg0: i32, %arg1: i32) -> (i32, i32) {
    %c0_i32 = arith.constant 0 : i32
    %c0_i32_0 = arith.constant 0 : i32
    return %arg0, %c0_i32 : i32, i32
  }
}

</mosaic_0001>

<bundles_post_ra>
// kernel: tpu_custom_call.1
= control target key start
LH: loop header
LB: loop body
LE: loop exit
PB: predicated region body
PF: predicated region fallthrough
CT: control target
= control target key end

     0   :  { %s3631_s0 = inlined_call_operand.hbm [shape: f32[16,16,16], index: 0, kind: input, shape index: {}]   ;;  %s3632_s1 = inlined_call_operand.vmem [shape: f32[16,128], index: 1, kind: input, shape index: {}]   ;;  %s3633_s2 = inlined_call_operand.vmem [shape: f32[32,128], index: 2, kind: input, shape index: {}]   ;;  %s3634_s3 = inlined_call_operand.vmem [shape: f32[1,128], index: 3, kind: input, shape index: {}]   ;;  %s3635_s4 = inlined_call_operand.hbm [shape: f32[16,128], index: 4, kind: input, shape index: {}]   ;;  %s3636_s5 = inlined_call_operand.vmem [shape: f32[32,128], index: 5, kind: input, shape index: {}]   ;;  %s3637_s6 = inlined_call_operand.vmem [shape: f32[1,128], index: 6, kind: input, shape index: {}]   ;;  %s3638_s7 = inlined_call_operand.hbm [shape: f32[16,32], index: 7, kind: input, shape index: {}]   ;;  %s3639_s8 = inlined_call_operand.hbm [shape: f32[16,32], index: 8, kind: input, shape index: {}]   ;;  %s3640_s9 = inlined_call_operand.hbm [shape: f32[16,32], index: 9, kind: input, shape index: {}]   ;;  %s3641_s10 = inlined_call_operand.hbm [shape: f32[16,32], index: 10, kind: input, shape index: {}]   ;;  %s3642_s11 = inlined_call_operand.vmem [shape: f32[32,16], index: 11, kind: input, shape index: {}]   ;;  %s3643_s12 = inlined_call_operand.vmem [shape: f32[32,16], index: 12, kind: input, shape index: {}]   ;;  %s3644_s13 = inlined_call_operand.vmem [shape: f32[1,16], index: 13, kind: input, shape index: {}]   ;;  %s3645_s14 = inlined_call_operand.hbm [shape: f32[16,16], index: 14, kind: output, shape index: {}]  }
   0x1   :  { %3661 = sst [smem:[#allocation22_spill]] %s3631_s0 }
   0x2   :  { %3662 = sst [smem:[#allocation23_spill]] %s3632_s1 }
   0x3   :  { %3663 = sst [smem:[#allocation24_spill]] %s3633_s2 }
   0x4   :  { %3664 = sst [smem:[#allocation25_spill]] %s3634_s3 }
   0x5   :  { %3665 = sst [smem:[#allocation26_spill]] %s3635_s4 }
   0x6   :  { %3666 = sst [smem:[#allocation27_spill]] %s3636_s5 }
   0x7   :  { %3667 = sst [smem:[#allocation28_spill]] %s3637_s6 }
   0x8   :  { %3668 = sst [smem:[#allocation29_spill]] %s3638_s7 }
   0x9   :  { %3669 = sst [smem:[#allocation30_spill]] %s3639_s8 }
   0xa   :  { %3670 = sst [smem:[#allocation31_spill]] %s3640_s9 }
   0xb   :  { %3671 = sst [smem:[#allocation32_spill]] %s3641_s10 }
   0xc   :  { %3672 = sst [smem:[#allocation33_spill]] %s3642_s11 }
   0xd   :  { %3673 = sst [smem:[#allocation34_spill]] %s3643_s12 }
   0xe   :  { %3674 = sst [smem:[#allocation35_spill]] %s3644_s13 }
   0xf   :  { %3675 = sst [smem:[#allocation36_spill]] %s3645_s14 }
  0x10   :  { %19 = vsyncpa [#allocation5], 0 }
  0x11   :  { %21 = vsyncpa [#allocation5 + $0x1], 0 }
  0x12   :  { %22 = vsyncpa [#allocation8], 0 }
  0x13   :  { %23 = vsyncpa [#allocation6], 0 }
  0x14   :  { %25 = vsyncpa [#allocation6 + $0x1], 0  ;;  %s3015_s29 = smov 0   ;;  %s3017_s30 = smov 0  }
  0x15   :  { %s3019_s15 = smov 0   ;;  %s3021_s16 = smov 0  }
  0x16   :  { %s3023_s17 = smov 0   ;;  %s3025_s18 = smov 0  }
  0x17   :  { %s3027_s19 = smov 0   ;;  %s3029_s20 = smov 0  }
  0x18   :  { %s3031_s21 = smov 0   ;;  %s3033_s22 = smov 0  }
  0x19   :  { %s3035_s23 = smov 0  }
  0x1a LB: > { %3676 = sst [smem:[#allocation18_spill]] %s2903_s19  ;;  %s40_s24 = sadd.s32 1, %s2911_s21  ;;  %s2919_s23 = sphi %s3035_s23, %s31_s23   ;;  %s2915_s22 = sphi %s3033_s22, %s3726_s22   ;;  %s2911_s21 = sphi %s3031_s21, %s3725_s21   ;;  %s2907_s20 = sphi %s3029_s20, %s3724_s20   ;;  %s2903_s19 = sphi %s3027_s19, %s3723_s19   ;;  %s2899_s18 = sphi %s3025_s18, %s3722_s18   ;;  %s2895_s17 = sphi %s3023_s17, %s3721_s17   ;;  %s2891_s16 = sphi %s3021_s16, %s3720_s16   ;;  %s2887_s15 = sphi %s3019_s15, %s3719_s15   ;;  %s2883_s30 = sphi %s3017_s30, %s3718_s30   ;;  %s2879_s29 = sphi %s3015_s29, %s3717_s29  }
  0x1b   : > { %3677 = sst [smem:[#allocation19_spill]] %s2907_s20  ;;  %s43_s25 = sadd.s32 1, %s2915_s22 }
  0x1c   : > { %p41_p0 = scmp.ge.s32.totalorder %s40_s24, 2  ;;  %s52_s26 = sadd.s32 1, %s2899_s18 }
  0x1d   : > { %p59_p1 = scmp.ne.s32.totalorder %s2899_s18, %s2895_s17  ;;  %p60_p2 = scmp.eq.s32.totalorder %s2919_s23, 0 }
  0x1e   : > { %s3728_s24 = smov (%p41_p0, %s40_s24), 0  ;;  %s3730_s25 = smov (!%p41_p0, %s43_s25), %s2915_s22 }
  0x1f   : > { %3678 = sst [smem:[#allocation20_spill]] %s3728_s24  ;;  %s47_s27 = ssub.s32 %s2911_s21, %s3728_s24 }
  0x20   : > { %p3083_p3 = por %p60_p2, %p59_p1  ;;  %p45_p4 = scmp.ge.s32.totalorder %s3730_s25, 2 }
  0x21   : > { %p2467_p5 = scmp.lt.s32.totalorder %s2919_s23, 4  ;;  %s445_s14 = sand.u32 1, %s2919_s23  }
  0x22   : > { %s3732_s25 = smov (%p45_p4, %s3730_s25), 0  ;;  %s447_s24 = sand.u32 1, %s2899_s18  }
  0x23   : > { %3680 = sst [smem:[#allocation21_spill]] %s3732_s25  ;;  %s3093_s20 = ssub.s32 %s2915_s22, %s3732_s25 }
  0x24   : > { %s49_s13 = sor.u32 %s3093_s20, %s47_s27  ;;  %p202_p6 = scmp.eq.s32.totalorder %s3093_s20, 0 }
  0x25   : > { %p50_p7 = scmp.eq.s32.totalorder %s49_s13, 0  ;;  %s2163_s12 = sshll.u32 %s447_s24, 6 }
  0x26   : > { %s2213_s11 = sshll.u32 %s2911_s21, 4  ;;  %s449_s2 = scalar_lea.vmem [#allocation4], %s2163_s12 }
  0x27   : > { %s3100_s6 = scalar_select %p50_p7, %s2899_s18, %s52_s26  }
  0x28   : > { %s455_s5 = sadd.s32 %s2915_s22, %s2213_s11  ;;  %s458_s1 = sshll.u32 %s449_s2, 4  ;;  %s459_s1 = int_to_ptr.vmem [resolvable:$true] %s458_s1 }
  0x29   : > { %s2166_s3 = sshll.u32 %s455_s5, 7  ;;  %s3681_s0 = sld [smem:[#allocation22_spill]] }
  0x2a   : > { %p3110_p8 = pnand %p2467_p5, %p3083_p3  ;;  %s3114_s13 = scalar_lea.sflag [#allocation5], %s445_s14 }
  0x2b   : > { %s2638_s11 = scalar_lea.vmem %s459_s1, 1024  ;;  %s2921_s2 = smov [#allocation4]  }
  0x2c   : > { %p2627_p9 = pneg %p3110_p8  ;;  %p2639_p10 = scmp.ne.s32.totalorder %s459_s1, %s2638_s11 }
  0x2d   : > { %s2643_s5 = sshll.u32 %s2921_s2, 4  ;;  %s2644_s5 = int_to_ptr.vmem [resolvable:$false] %s2643_s5 }
  0x2e   : > { %p2641_p11 = pnand %p2639_p10, %p2627_p9  ;;  %p2646_p13 = scmp.lt.s32.totalorder %s459_s1, %s2644_s5 }
  0x2f   : > { %s457_s10 = scalar_lea.hbm %s3681_s0, %s2166_s3  ;;  %s2645_s3 = scalar_lea.vmem %s2644_s5, 2048 }
  0x30   : > { %p2642_p12 = pneg %p2641_p11  ;;  %p2647_p0 = scmp.lt.s32.totalorder %s2645_s3, %s2638_s11 }
  0x32   : > { %p2648_p1 = por %p2647_p0, %p2646_p13 }
  0x34   : > { %p2649_p3 = pnand %p2648_p1, %p2642_p12 }
  0x36   : > { %2652 = shalt.err (!%p2649_p3)
}
  0x37   : > { %s2922_s4 = smov 256   ;;  %s3653_s12 = smov 128  }
  0x38   : > { %s3654_s14 = smov 8   ;;  %s2159_s19 = sadd.s32 4294967294, %s2919_s23  }
  0x39   : > { %2449 = dma.hbm_to_vmem [thread:$0]  (!%p3110_p8), %s457_s10, 1024, %s459_s1, %s3114_s13, %s2922_s4, %s3653_s12, %s3654_s14  }
  0x3a   : > { %s204_s24 = sadd.s32 1, %s2887_s15  ;;  %p211_p4 = scmp.ne.s32.totalorder %s2887_s15, %s2883_s30 }
  0x3b   : > { %s3130_s26 = scalar_select %p202_p6, %s2887_s15, %s204_s24  }
  0x3c   : > { %p213_p7 = por %p211_p4, %p60_p2  ;;  %p217_p9 = scmp.ne.s32.totalorder %s2883_s30, %s2879_s29 }
  0x3d   : > { %p388_p10 = scmp.eq.s32.totalorder %s2159_s19, 3  ;;  %s470_s28 = sand.u32 1, %s2887_s15  }
  0x3e   : > { %s3140_s11 = sshll.u32 %s470_s28, 3  ;;  %s3143_s27 = sshll.u32 %s2915_s22, 7 }
  0x3f   : > { %p3148_p8 = por %p388_p10, %p217_p9  ;;  %s3684_s7 = sld [smem:[#allocation29_spill]] }
  0x40   : > { %s472_s5 = scalar_lea.vmem [#allocation9], %s3140_s11  ;;  %p3159_p2 = pnand %p2467_p5, %p213_p7 }
  0x41   : > { %s3683_s1 = scalar_select %p3148_p8, 1, 0 }
  0x42   : > { %s479_s3 = sshll.u32 %s472_s5, 4  ;;  %s3686_s8 = sld [smem:[#allocation30_spill]]  ;;  %s480_s3 = int_to_ptr.vmem [resolvable:$true] %s479_s3 }
  0x43   : > { %s490_s12 = scalar_lea.vmem [#allocation10], %s3140_s11  ;;  %p2655_p6 = pneg %p3159_p2 }
  0x44   : > { %s497_s14 = sshll.u32 %s490_s12, 4  ;;  %s2666_s10 = scalar_lea.vmem %s480_s3, 128  ;;  %s498_s14 = int_to_ptr.vmem [resolvable:$true] %s497_s14 }
  0x45   : > { %s477_s2 = scalar_lea.hbm %s3684_s7, %s3143_s27  ;;  %p2667_p11 = scmp.ne.s32.totalorder %s480_s3, %s2666_s10 }
  0x46   : > { %s2925_s20 = smov [#allocation9]  }
  0x47   : > { %p2669_p12 = pnand %p2667_p11, %p2655_p6  ;;  %s2671_s5 = sshll.u32 %s2925_s20, 4  ;;  %s2672_s5 = int_to_ptr.vmem [resolvable:$false] %s2671_s5 }
  0x48   : > { %s495_s28 = scalar_lea.hbm %s3686_s8, %s3143_s27  ;;  %s2673_s0 = scalar_lea.vmem %s2672_s5, 256 }
  0x49   : > { %p2670_p13 = pneg %p2669_p12  ;;  %p2674_p5 = scmp.lt.s32.totalorder %s480_s3, %s2672_s5 }
  0x4a   : > { %p2675_p0 = scmp.lt.s32.totalorder %s2673_s0, %s2666_s10 }
  0x4c   : > { %p2676_p1 = por %p2675_p0, %p2674_p5 }
  0x4e   : > { %p2677_p3 = pnand %p2676_p1, %p2670_p13 }
  0x50   : > { %2680 = shalt.err (!%p2677_p3)
}
  0x51   : > { %2452 = dma.hbm_to_vmem [thread:$0]  (!%p3159_p2), %s477_s2, 128, %s480_s3, %s3114_s13  }
  0x52   : > { %s2694_s12 = scalar_lea.vmem %s498_s14, 128  ;;  %s2926_s19 = smov [#allocation10]  }
  0x53   : > { %p2695_p7 = scmp.ne.s32.totalorder %s498_s14, %s2694_s12  ;;  %s2699_s24 = sshll.u32 %s2926_s19, 4  ;;  %s2700_s24 = int_to_ptr.vmem [resolvable:$false] %s2699_s24 }
  0x54   : > { %s2701_s20 = scalar_lea.vmem %s2700_s24, 256  ;;  %p2702_p12 = scmp.lt.s32.totalorder %s498_s14, %s2700_s24 }
  0x55   : > { %p2697_p10 = pnand %p2695_p7, %p2655_p6  ;;  %p2703_p5 = scmp.lt.s32.totalorder %s2701_s20, %s2694_s12 }
  0x57   : > { %p2698_p11 = pneg %p2697_p10  ;;  %p2704_p13 = por %p2703_p5, %p2702_p12 }
  0x59   : > { %p2705_p0 = pnand %p2704_p13, %p2698_p11 }
  0x5b   : > { %2708 = shalt.err (!%p2705_p0)
}
  0x5c   : > { %2455 = dma.hbm_to_vmem [thread:$0]  (!%p3159_p2), %s495_s28, 128, %s498_s14, %s3114_s13  }
  0x5d   : > { %s3687_s9 = sld [smem:[#allocation31_spill]]  ;;  %s508_s12 = scalar_lea.vmem [#allocation11], %s3140_s11 }
  0x5e   : > { %s515_s19 = sshll.u32 %s508_s12, 4  ;;  %s2927_s20 = smov [#allocation11]   ;;  %s516_s19 = int_to_ptr.vmem [resolvable:$true] %s515_s19 }
  0x5f   : > { %s2722_s24 = scalar_lea.vmem %s516_s19, 128  ;;  %s2727_s0 = sshll.u32 %s2927_s20, 4  ;;  %s2728_s0 = int_to_ptr.vmem [resolvable:$false] %s2727_s0 }
  0x60   : > { %p2723_p1 = scmp.ne.s32.totalorder %s516_s19, %s2722_s24  ;;  %s2729_s2 = scalar_lea.vmem %s2728_s0, 256 }
  0x61   : > { %p2730_p10 = scmp.lt.s32.totalorder %s516_s19, %s2728_s0  ;;  %p2731_p11 = scmp.lt.s32.totalorder %s2729_s2, %s2722_s24 }
  0x62   : > { %p2725_p3 = pnand %p2723_p1, %p2655_p6 }
  0x63   : > { %s513_s5 = scalar_lea.hbm %s3687_s9, %s3143_s27  ;;  %p2732_p12 = por %p2731_p11, %p2730_p10 }
  0x64   : > { %p2726_p7 = pneg %p2725_p3 }
  0x66   : > { %p2733_p5 = pnand %p2732_p12, %p2726_p7 }
  0x68   : > { %2736 = shalt.err (!%p2733_p5)
}
  0x69   : > { %2458 = dma.hbm_to_vmem [thread:$0]  (!%p3159_p2), %s513_s5, 128, %s516_s19, %s3114_s13  }
  0x6a   : > { %s3199_s14 = sadd.s32 4294967295, %s2919_s23   ;;  %p65_p13 = scmp.ne.s32.totalorder %s2895_s17, %s2891_s16 }
  0x6b   : > { %p3658_p0 = scmp.eq.s32.totalorder %s3199_s14, 0  ;;  %p382_p1 = scmp.eq.s32.totalorder %s3199_s14, 3 }
  0x6c   : > { %p2160_p3 = scmp.ge.s32.totalorder %s2919_s23, 1  ;;  %p395_p12 = scmp.lt.s32.totalorder %s2919_s23, 5 }
  0x6d   : > { %p3208_p7 = por %p3658_p0, %p65_p13  ;;  %p3217_p10 = por %p217_p9, %p3658_p0 }
  0x6e   : > { %p3224_p11 = por %p382_p1, %p211_p4  ;;  %p3229_p5 = pnand %p2160_p3, %p395_p12 }
  0x6f   : > { %s3688_s28 = scalar_select %p3208_p7, 1, 0 }
  0x70   : > { %s3689_s3 = scalar_select %p3217_p10, 1, 0 }
  0x71   : > { %s3690_s10 = scalar_select %p3224_p11, 1, 0 }
  0x72   : > { %s2928_s5 = smov [#allocation7]   ;;  %p2442_p13 = pneg %p3229_p5 }
  0x73   : > { %s416_s12 = sshll.u32 %s2928_s5, 4  ;;  %s3692_s20 = sld [smem:[#allocation32_spill]]  ;;  %s3239_s12 = int_to_ptr.vmem [resolvable:$true] %s416_s12 }
  0x74   : > { %s526_s2 = scalar_lea.vmem [#allocation12], %s3140_s11  ;;  %p3244_p4 = pnand %p2442_p13, %p3658_p0 }
  0x75   : > { %s533_s7 = sshll.u32 %s526_s2, 4  ;;  %s2929_s5 = smov [#allocation12]   ;;  %s534_s7 = int_to_ptr.vmem [resolvable:$true] %s533_s7 }
  0x76   : > { %s2750_s9 = scalar_lea.vmem %s534_s7, 128  ;;  %s2755_s25 = sshll.u32 %s2929_s5, 4  ;;  %s2756_s25 = int_to_ptr.vmem [resolvable:$false] %s2755_s25 }
  0x77   : > { %p2751_p9 = scmp.ne.s32.totalorder %s534_s7, %s2750_s9  ;;  %p2758_p12 = scmp.lt.s32.totalorder %s534_s7, %s2756_s25 }
  0x79   : > { %s531_s0 = scalar_lea.hbm %s3692_s20, %s3143_s27  ;;  %p2753_p1 = pnand %p2751_p9, %p2655_p6 }
  0x7a   : > { %s2757_s27 = scalar_lea.vmem %s2756_s25, 256 }
  0x7b   : > { %p2754_p3 = pneg %p2753_p1  ;;  %p2759_p8 = scmp.lt.s32.totalorder %s2757_s27, %s2750_s9 }
  0x7d   : > { %p2760_p11 = por %p2759_p8, %p2758_p12 }
  0x7f   : > { %p2761_p10 = pnand %p2760_p11, %p2754_p3 }
  0x81   : > { %2764 = shalt.err (!%p2761_p10)
}
  0x82   : > { %2461 = dma.hbm_to_vmem [thread:$0]  (!%p3159_p2), %s531_s0, 128, %s534_s7, %s3114_s13  }
  0x83   : > { %p2767_p6 = pneg %p3244_p4  ;;  %s2776_s11 = scalar_lea.vmem %s3239_s12, 256 }
  0x84   : > { %p2777_p13 = scmp.ne.s32.totalorder %s3239_s12, %s2776_s11  ;;  %p2784_p0 = scmp.lt.s32.totalorder %s3239_s12, %s3239_s12 }
  0x85   : > { %p2785_p7 = scmp.lt.s32.totalorder %s2776_s11, %s2776_s11 }
  0x86   : > { %p2779_p9 = pnand %p2777_p13, %p2767_p6 }
  0x87   : > { %p2786_p8 = por %p2785_p7, %p2784_p0 }
  0x88   : > { %p2780_p1 = pneg %p2779_p9 }
  0x8a   : > { %p2787_p11 = pnand %p2786_p8, %p2780_p1 }
  0x8c   : > { %2790 = shalt.err (!%p2787_p11)
}
  0x8d   : > { %s3694_s9 = smov 8   ;;  %s3695_s25 = smov 128  }
  0x8e   : > { %s3696_s13 = sld [smem:[#allocation26_spill]]  ;;  %s544_s19 = sand.u32 (!%p3229_p5), 1, %s3199_s14  }
  0x8f   : > { %s546_s24 = sand.u32 (!%p3229_p5), 1, %s2895_s17   ;;  %s545_s0 = scalar_lea.sflag (!%p3229_p5), [#allocation5], %s544_s19 }
  0x90   : > { %542 = sbr.rel (%p3229_p5) target bundleno = 6625 (0x19e1), region = 76  ;;  %s2176_s20 = sshll.u32 (!%p3229_p5), %s546_s24, 6 }
  0x91   : > { %s3273_s2 = scalar_lea.vmem (!%p3229_p5), [#allocation4], %s2176_s20  ;;  %p3697_p2 = scmp.ne.s32.totalorder (!%p3229_p5), %s3688_s28, 0 }
  0x94   : > { %2445 = dma.hbm_to_vmem [thread:$0]  (!%p3244_p4), %s3696_s13, 256, %s3239_s12, [#allocation8], %s3695_s25, %s3695_s25, %s3694_s9  }
  0x95   : > { %2862 = dma.done.wait (%p3697_p2), %s545_s0, 1024  }
  0x96   : > { %2864 = vsyncadd (%p3697_p2), %s545_s0, 4294966272  ;;  %p3698_p0 = scmp.eq.s32.totalorder %s3199_s14, 0 }
  0x98   : > { %2866 = dma.done.wait (%p3698_p0), [#allocation8], 256   ;;  %p3699_p7 = pmov %p3698_p0 }
  0x99   : > { %s559_s8 = sand.u32 1, %s2883_s30   ;;  %p3700_p10 = scmp.ne.s32.totalorder %s3689_s3, 0 }
  0x9a   : > { %2868 = vsyncadd (%p3699_p7), [#allocation8], 4294967040  ;;  %s3286_s16 = sshll.u32 %s559_s8, 3 }
  0x9b   : > { %s561_s12 = scalar_lea.vmem [#allocation9], %s3286_s16 }
  0x9c   : > { %2870 = dma.done.wait (%p3700_p10), %s545_s0, 512  }
  0x9d   : > { %2872 = vsyncadd (%p3700_p10), %s545_s0, 4294966784  ;;  %s570_s14 = scalar_lea.vmem [#allocation10], %s3286_s16  ;;  %s579_s28 = scalar_lea.vmem [#allocation11], %s3286_s16 }
  0x9e   : > { %s588_s5 = scalar_lea.vmem [#allocation12], %s3286_s16  ;;  %s652_s27 = scalar_lea.vmem [#allocation13], %s3286_s16 }
  0x9f   : > { %s3701_s11 = sld [smem:[#allocation18_spill]] }
  0xa5   : > { %p2183_p5 = scmp.ne.s32.totalorder %s3701_s11, 0 }
  0xa7   : > { %657 = sbr.rel (%p2183_p5) target bundleno = 174 (0xae), region = 104 }
  0xac   : > { %v658_v0 = vld [vmem:[%s561_s12] sm:$0xff]  ;;  %vm659_vm0 = vcmask 261120   ;;  %v661_v1 = vld [vmem:[%s570_s14] sm:$0xff] }
  0xad   : > { %660 = vst.msk [vmem:[#allocation2] sm:$0xff] %vm659_vm0, %v658_v0  ;;  %662 = vst.msk [vmem:[#allocation3] sm:$0xff] %vm659_vm0, %v661_v1 }
  0xae PF: > { %s3702_s25 = sld [smem:[#allocation23_spill]]  ;;  %v2930_v5 = vmov 0.0   ;;  %v663_v6 = vld [vmem:[%s3273_s2] sm:$0xff]  ;;  %vm680_vm1 = vcmask 130048   ;;  %v664_v8 = vld [vmem:[%s3273_s2 + $0x8] sm:$0xff]  ;;  %vm2931_vm2 = vmmov 0  }
  0xaf   : > { %s3703_s13 = sld [smem:[#allocation24_spill]]  ;;  %2298 = vmatprep.subr.mxu1 %v2930_v5  ;;  %2286 = vmatprep.mubr.msk.f32.mxu0 %vm680_vm1, %v663_v6  ;;  %vm816_vm3 = vcmask 261120   ;;  %s2932_s19 = smov 64   ;;  %v665_v49 = vld [vmem:[%s3273_s2 + $0x10] sm:$0xff]  ;;  %v666_v50 = vld [vmem:[%s3273_s2 + $0x18] sm:$0xff]  ;;  %v667_v51 = vld [vmem:[%s3273_s2 + $0x20] sm:$0xff] }
  0xb0   : > { %2306 = vmatprep.mubr.msk.f32.mxu1 %vm2931_vm2, %v2930_v5  ;;  %s3704_s7 = sld [smem:[#allocation25_spill]]  ;;  %s2933_s24 = smov 32   ;;  %v668_v52 = vld [vmem:[%s3273_s2 + $0x28] sm:$0xff]  ;;  %v669_v53 = vld [vmem:[%s3273_s2 + $0x30] sm:$0xff]  ;;  %v670_v54 = vld [vmem:[%s3273_s2 + $0x38] sm:$0xff] }
  0xb1   : > { %s2934_s20 = smov 96   ;;  %s3705_s0 = sld [smem:[#allocation18_spill]] }
  0xb4   : > { %v672_v2 = vld [vmem:[%s3702_s25 + $0x8] sm:$0xff]  ;;  %v671_v4 = vld [vmem:[%s3702_s25] sm:$0xff] }
  0xb5   : > { %v3304_v3 = vld [vmem:[%s3703_s13 + $0x18] sm:$0xff]  ;;  %2282 = vmatprep.subr.mxu0 %v672_v2  ;;  %v3315_v7 = vld [vmem:[%s3703_s13 + $0x10] sm:$0xff]  ;;  %v3323_v9 = vld [vmem:[%s3703_s13 + $0x8] sm:$0xff] }
  0xb6   : > { %2283 = vmatpush3.msra.mxu0 %v672_v2  ;;  %2299 = vmatpush3.msra.mxu1 %v3304_v3  ;;  %v3331_v10 = vld [vmem:[%s3703_s13] sm:$0xff]  ;;  %v811_v20 = vld [vmem:[#allocation3] sm:$0xff] }
  0xb7   : > { %2284 = vmatprep.subr.mxu0 %v671_v4  ;;  %2300 = vmatprep.subr.mxu1 %v2930_v5  ;;  %v810_v11 = vld [vmem:[#allocation2] sm:$0xff]  ;;  %p2201_p4 = scmp.ne.s32.totalorder %s3705_s0, 1 }
  0xb8   : > { %2285 = vmatpush3.msra.mxu0 %v671_v4  ;;  %2301 = vmatpush3.msra.mxu1 %v3315_v7  ;;  %v3362_v13 = vld [vmem:[%s3704_s7] ss:$0 sm:$0xff]  ;;  %s3706_s11 = sld [smem:[#allocation27_spill]] (!%p2201_p4)  ;;  %s2938_s12 = smov (!%p2201_p4), 32  }
  0xb9   : > { %2287 = vmatmul.mubr.msk.f32.vlgmr.msra.gmra.mxu0 %vm680_vm1, %v664_v8  ;;  %2302 = vmatprep.subr.mxu1 %v2930_v5  ;;  %s3707_s0 = sld [smem:[#allocation28_spill]] (!%p2201_p4) }
  0xba   : > { %2303 = vmatpush3.msra.mxu1 %v3323_v9  ;;  %2320 = vmatprep.subr.mxu0 %v2930_v5  ;;  %s3709_s7 = sld [smem:[#allocation34_spill]] (!%p2201_p4) }
  0xbb   : > { %2304 = vmatprep.subr.mxu1 %v2930_v5  ;;  %2321 = vmatpush3.msra.mxu0 %v3304_v3  ;;  %s3710_s14 = sld [smem:[#allocation35_spill]] (!%p2201_p4) }
  0xbc   : > { %2305 = vmatpush3.msra.mxu1 %v3331_v10  ;;  %2322 = vmatprep.subr.mxu0 %v2930_v5 }
  0xbd   : > { %2307 = vmatmul.mubr.msk.f32.vlgmr.msra.gmra.mxu1 %vm816_vm3, %v810_v11  ;;  %2309 = vmatprep.subr.mxu1 %v2930_v5 }
  0xbe   : > { %2310 = vmatpush3.msra.mxu1 %v3304_v3  ;;  %2317 = vmatprep.mubr.msk.f32.mxu1 %vm2931_vm2, %v2930_v5 }
  0xbf   : > { %2311 = vmatprep.subr.mxu1 %v2930_v5  ;;  %2323 = vmatpush3.msra.mxu0 %v3315_v7 }
  0xc0   : > { %2312 = vmatpush3.msra.mxu1 %v3315_v7  ;;  %2324 = vmatprep.subr.mxu0 %v2930_v5 }
  0xc1   : > { %2313 = vmatprep.subr.mxu1 %v2930_v5  ;;  %2325 = vmatpush3.msra.mxu0 %v3323_v9 }
  0xc2   : > { %2314 = vmatpush3.msra.mxu1 %v3323_v9  ;;  %2326 = vmatprep.subr.mxu0 %v2930_v5 }
  0xc3   : > { %2315 = vmatprep.subr.mxu1 %v2930_v5  ;;  %2327 = vmatpush3.msra.mxu0 %v3331_v10 }
  0xc4   : > { %2316 = vmatpush3.msra.mxu1 %v3331_v10  ;;  %2342 = vmatprep.subr.mxu0 %v2930_v5 }
  0xc5   : > { %2331 = vmatprep.subr.mxu1 %v2930_v5  ;;  %2289 = vmatprep.mubr.msk.f32.mxu0 %vm680_vm1, %v665_v49 }
  0xc6   : > { %2290 = vmatmul.mubr.msk.f32.gmra.mxu0 %vm680_vm1, %v666_v50 }
  0xc7   : > { %2292 = vmatprep.mubr.msk.f32.mxu0 %vm680_vm1, %v667_v51 }
  0xca   : > { %2293 = vmatmul.mubr.msk.f32.gmra.mxu0 %vm680_vm1, %v668_v52 }
  0xcb   : > { %2295 = vmatprep.mubr.msk.f32.mxu0 %vm680_vm1, %v669_v53 }
  0xce   : > { %2296 = vmatmul.mubr.msk.f32.gmra.mxu0 %vm680_vm1, %v670_v54 }
  0xcf   : > { %2328 = vmatprep.mubr.msk.f32.mxu0 %vm2931_vm2, %v2930_v5 }
 0x179   : > { %v2288_v12 = vpop.f32.mrf.mxu0 }
 0x17a   : > { %v777_v35 = vadd.f32 %v2288_v12, %v3362_v13 }
 0x17b   : > { %v771_v14 = vpop.f32.mrf.mxu0 }
 0x17c   : > { %v772_v15 = vadd.f32 %v3362_v13, %v771_v14 }
 0x17d   : > { %v886_v16 = vpop.f32.mrf.mxu1 }
 0x17e   : > { %v890_v17 = vadd.f32 %v886_v16, %v772_v15 }
 0x17f   : > { %v2308_v18 = vpop.f32.mrf.mxu1 }
 0x180   : > { %2571 = vtanh.f32 %v890_v17  ;;  %v891_v21 = vmul.f32 0.5, %v890_v17 }
 0x182   : > { %2573 = vtanh.f32 %v891_v21 }
 0x186   : > { %v2291_v59 = vpop.f32.mrf.mxu0 }
 0x188   : > { %v781_v60 = vpop.f32.mrf.mxu0 }
 0x189   : > { %v782_v1 = vadd.f32 %v3362_v13, %v781_v60 }
 0x18a   : > { %v3411_v61 = vpop.f32.mrf.mxu0 }
 0x18c   : > { %v3413_v62 = vpop.f32.mrf.mxu0 }
 0x18d   : > { %v2572_v19 = vpop.eup %2571 }
 0x18e   : > { %902 = vrot.lane.b32.xlu0 %v2572_v19, %s2932_s19  ;;  %v3415_v63 = vpop.f32.mrf.mxu0 }
 0x18f   : > { %v2574_v22 = vpop.eup %2573 }
 0x190   : > { %v893_v23 = vadd.f32 1.0, %v2574_v22  ;;  %v3417_v0 = vpop.f32.mrf.mxu0 }
 0x192   : > { %897 = vrot.lane.b32.xlu0 %v811_v20, %s2933_s24  ;;  %v894_v24 = vmul.f32 0.5, %v893_v23 }
 0x200   : > { %v903_v25 = vpop.permute.xlu0 %902 }
 0x201   : > { %v905_v26 = vmul.f32 %v903_v25, %v894_v24  ;;  %v787_v25 = vadd.f32 %v2291_v59, %v3362_v13 }
 0x203   : > { %907 = vrot.lane.b32.xlu1 %v905_v26, %s2933_s24 }
 0x204   : > { %v898_v27 = vpop.permute.xlu0 %897 }
 0x205   : > { %v900_v28 = vmul.f32 %v898_v27, %v894_v24 }
 0x275   : > { %v908_v29 = vpop.permute.xlu1 %907 }
 0x276   : > { %v910_v30 = vadd.f32 %v908_v29, %v900_v28 }
 0x278   : > { %2575 = vtanh.f32 %v910_v30 }
 0x285   : > { %v2576_v31 = vpop.eup %2575 }
 0x286   : > { %913 = vrot.lane.b32.xlu1 %v2576_v31, %s2932_s19 }
 0x2f8   : > { %v914_v32 = vpop.permute.xlu1 %913 }
 0x2f9   : > { %v916_v33 = vmul.f32 %v914_v32, %v894_v24 }
 0x2fb   : > { %918 = vrot.lane.b32.xlu0 %v916_v33, %s2933_s24 }
 0x36d   : > { %v919_v34 = vpop.permute.xlu0 %918 }
 0x36e   : > { %2318 = vmatmul.mubr.msk.f32.vlgmr.msra.gmra.mxu1 %vm816_vm3, %v919_v34 }
 0x36f   : > { %2332 = vmatpush3.msra.mxu1 %v3304_v3  ;;  %2339 = vmatprep.mubr.msk.f32.mxu1 %vm2931_vm2, %v2930_v5 }
 0x370   : > { %2333 = vmatprep.subr.mxu1 %v2930_v5 }
 0x371   : > { %2334 = vmatpush3.msra.mxu1 %v3315_v7 }
 0x372   : > { %2335 = vmatprep.subr.mxu1 %v2930_v5 }
 0x373   : > { %2336 = vmatpush3.msra.mxu1 %v3323_v9 }
 0x374   : > { %2337 = vmatprep.subr.mxu1 %v2930_v5 }
 0x375   : > { %2338 = vmatpush3.msra.mxu1 %v3331_v10 }
 0x376   : > { %2353 = vmatprep.subr.mxu1 %v2930_v5 }
 0x42e   : > { %v988_v36 = vpop.f32.mrf.mxu1 }
 0x42f   : > { %v992_v37 = vadd.f32 %v988_v36, %v777_v35 }
 0x430   : > { %v2319_v38 = vpop.f32.mrf.mxu1 }
 0x431   : > { %2577 = vtanh.f32 %v992_v37  ;;  %v993_v40 = vmul.f32 0.5, %v992_v37 }
 0x433   : > { %2579 = vtanh.f32 %v993_v40 }
 0x43e   : > { %v2578_v39 = vpop.eup %2577 }
 0x43f   : > { %1000 = vrot.lane.b32.xlu1 %v2578_v39, %s2932_s19 }
 0x440   : > { %v2580_v41 = vpop.eup %2579 }
 0x441   : > { %v995_v42 = vadd.f32 1.0, %v2580_v41 }
 0x443   : > { %v996_v43 = vmul.f32 0.5, %v995_v42 }
 0x445   : > { %v998_v46 = vmul.f32 %v996_v43, %v910_v30 }
 0x4b1   : > { %v1001_v44 = vpop.permute.xlu1 %1000 }
 0x4b2   : > { %v1003_v45 = vmul.f32 %v1001_v44, %v996_v43 }
 0x4b4   : > { %1005 = vrot.lane.b32.xlu0 %v1003_v45, %s2933_s24 }
 0x526   : > { %v1006_v47 = vpop.permute.xlu0 %1005 }
 0x527   : > { %v1008_v48 = vadd.f32 %v1006_v47, %v998_v46 }
 0x529   : > { %2581 = vtanh.f32 %v1008_v48 }
 0x536   : > { %v2582_v55 = vpop.eup %2581 }
 0x537   : > { %1011 = vrot.lane.b32.xlu1 %v2582_v55, %s2932_s19 }
 0x5a9   : > { %v1012_v56 = vpop.permute.xlu1 %1011 }
 0x5aa   : > { %v1014_v57 = vmul.f32 %v1012_v56, %v996_v43  ;;  %v792_v43 = vadd.f32 %v3362_v13, %v3413_v62  ;;  %v797_v62 = vadd.f32 %v3411_v61, %v3362_v13 }
 0x5ac   : > { %1016 = vrot.lane.b32.xlu0 %v1014_v57, %s2933_s24 }
 0x61e   : > { %v1017_v58 = vpop.permute.xlu0 %1016 }
 0x61f   : > { %2329 = vmatmul.mubr.msk.f32.vlgmr.msra.gmra.mxu0 %vm816_vm3, %v1017_v58 }
 0x620   : > { %2343 = vmatpush3.msra.mxu0 %v3304_v3  ;;  %2350 = vmatprep.mubr.msk.f32.mxu0 %vm2931_vm2, %v2930_v5 }
 0x621   : > { %2344 = vmatprep.subr.mxu0 %v2930_v5 }
 0x622   : > { %2345 = vmatpush3.msra.mxu0 %v3315_v7 }
 0x623   : > { %2346 = vmatprep.subr.mxu0 %v2930_v5 }
 0x624   : > { %2347 = vmatpush3.msra.mxu0 %v3323_v9 }
 0x625   : > { %2348 = vmatprep.subr.mxu0 %v2930_v5 }
 0x626   : > { %2349 = vmatpush3.msra.mxu0 %v3331_v10 }
 0x627   : > { %2364 = vmatprep.subr.mxu0 %v2930_v5 }
 0x6df   : > { %v1086_v2 = vpop.f32.mrf.mxu0 }
 0x6e0   : > { %v1090_v4 = vadd.f32 %v1086_v2, %v782_v1 }
 0x6e1   : > { %v2330_v6 = vpop.f32.mrf.mxu0 }
 0x6e2   : > { %2583 = vtanh.f32 %v1090_v4  ;;  %v1091_v11 = vmul.f32 0.5, %v1090_v4 }
 0x6e4   : > { %2585 = vtanh.f32 %v1091_v11 }
 0x6ef   : > { %v2584_v8 = vpop.eup %2583 }
 0x6f0   : > { %1098 = vrot.lane.b32.xlu1 %v2584_v8, %s2932_s19 }
 0x6f1   : > { %v2586_v12 = vpop.eup %2585 }
 0x6f2   : > { %v1093_v14 = vadd.f32 1.0, %v2586_v12 }
 0x6f4   : > { %v1094_v15 = vmul.f32 0.5, %v1093_v14 }
 0x6f6   : > { %v1096_v18 = vmul.f32 %v1094_v15, %v1008_v48 }
 0x762   : > { %v1099_v16 = vpop.permute.xlu1 %1098 }
 0x763   : > { %v1101_v17 = vmul.f32 %v1099_v16, %v1094_v15 }
 0x765   : > { %1103 = vrot.lane.b32.xlu0 %v1101_v17, %s2933_s24 }
 0x7d7   : > { %v1104_v19 = vpop.permute.xlu0 %1103 }
 0x7d8   : > { %v1106_v20 = vadd.f32 %v1104_v19, %v1096_v18  ;;  %v802_v18 = vadd.f32 %v3362_v13, %v3417_v0 }
 0x7da   : > { %2587 = vtanh.f32 %v1106_v20 }
 0x7e7   : > { %v2588_v21 = vpop.eup %2587 }
 0x7e8   : > { %1109 = vrot.lane.b32.xlu1 %v2588_v21, %s2932_s19 }
 0x85a   : > { %v1110_v22 = vpop.permute.xlu1 %1109 }
 0x85b   : > { %v1112_v23 = vmul.f32 %v1110_v22, %v1094_v15 }
 0x85d   : > { %1114 = vrot.lane.b32.xlu0 %v1112_v23, %s2933_s24 }
 0x8cf   : > { %v1115_v24 = vpop.permute.xlu0 %1114 }
 0x8d0   : > { %2340 = vmatmul.mubr.msk.f32.vlgmr.msra.gmra.mxu1 %vm816_vm3, %v1115_v24 }
 0x8d1   : > { %2354 = vmatpush3.msra.mxu1 %v3304_v3  ;;  %2361 = vmatprep.mubr.msk.f32.mxu1 %vm2931_vm2, %v2930_v5 }
 0x8d2   : > { %2355 = vmatprep.subr.mxu1 %v2930_v5 }
 0x8d3   : > { %2356 = vmatpush3.msra.mxu1 %v3315_v7 }
 0x8d4   : > { %2357 = vmatprep.subr.mxu1 %v2930_v5 }
 0x8d5   : > { %2358 = vmatpush3.msra.mxu1 %v3323_v9 }
 0x8d6   : > { %2359 = vmatprep.subr.mxu1 %v2930_v5 }
 0x8d7   : > { %2360 = vmatpush3.msra.mxu1 %v3331_v10 }
 0x8d8   : > { %2375 = vmatprep.subr.mxu1 %v2930_v5 }
 0x990   : > { %v1184_v26 = vpop.f32.mrf.mxu1 }
 0x991   : > { %v1188_v27 = vadd.f32 %v1184_v26, %v787_v25 }
 0x992   : > { %v2341_v28 = vpop.f32.mrf.mxu1 }
 0x993   : > { %2589 = vtanh.f32 %v1188_v27  ;;  %v1189_v30 = vmul.f32 0.5, %v1188_v27 }
 0x995   : > { %2591 = vtanh.f32 %v1189_v30 }
 0x9a0   : > { %v2590_v29 = vpop.eup %2589 }
 0x9a1   : > { %1196 = vrot.lane.b32.xlu1 %v2590_v29, %s2932_s19 }
 0x9a2   : > { %v2592_v31 = vpop.eup %2591 }
 0x9a3   : > { %v1191_v32 = vadd.f32 1.0, %v2592_v31 }
 0x9a5   : > { %v1192_v33 = vmul.f32 0.5, %v1191_v32 }
 0x9a7   : > { %v1194_v36 = vmul.f32 %v1192_v33, %v1106_v20 }
 0xa13   : > { %v1197_v34 = vpop.permute.xlu1 %1196 }
 0xa14   : > { %v1199_v35 = vmul.f32 %v1197_v34, %v1192_v33 }
 0xa16   : > { %1201 = vrot.lane.b32.xlu0 %v1199_v35, %s2933_s24  ;;  %v807_v35 = vadd.f32 %v3415_v63, %v3362_v13 }
 0xa88   : > { %v1202_v37 = vpop.permute.xlu0 %1201 }
 0xa89   : > { %v1204_v38 = vadd.f32 %v1202_v37, %v1194_v36 }
 0xa8b   : > { %2593 = vtanh.f32 %v1204_v38 }
 0xa98   : > { %v2594_v39 = vpop.eup %2593 }
 0xa99   : > { %1207 = vrot.lane.b32.xlu1 %v2594_v39, %s2932_s19 }
 0xb0b   : > { %v1208_v40 = vpop.permute.xlu1 %1207 }
 0xb0c   : > { %v1210_v41 = vmul.f32 %v1208_v40, %v1192_v33 }
 0xb0e   : > { %1212 = vrot.lane.b32.xlu0 %v1210_v41, %s2933_s24 }
 0xb80   : > { %v1213_v42 = vpop.permute.xlu0 %1212 }
 0xb81   : > { %2351 = vmatmul.mubr.msk.f32.vlgmr.msra.gmra.mxu0 %vm816_vm3, %v1213_v42 }
 0xb82   : > { %2365 = vmatpush3.msra.mxu0 %v3304_v3  ;;  %2372 = vmatprep.mubr.msk.f32.mxu0 %vm2931_vm2, %v2930_v5 }
 0xb83   : > { %2366 = vmatprep.subr.mxu0 %v2930_v5 }
 0xb84   : > { %2367 = vmatpush3.msra.mxu0 %v3315_v7 }
 0xb85   : > { %2368 = vmatprep.subr.mxu0 %v2930_v5 }
 0xb86   : > { %2369 = vmatpush3.msra.mxu0 %v3323_v9 }
 0xb87   : > { %2370 = vmatprep.subr.mxu0 %v2930_v5 }
 0xb88   : > { %2371 = vmatpush3.msra.mxu0 %v3331_v10 }
 0xc41   : > { %v1282_v44 = vpop.f32.mrf.mxu0 }
 0xc42   : > { %v1286_v45 = vadd.f32 %v1282_v44, %v792_v43 }
 0xc43   : > { %v2352_v46 = vpop.f32.mrf.mxu0 }
 0xc44   : > { %2595 = vtanh.f32 %v1286_v45  ;;  %v1287_v48 = vmul.f32 0.5, %v1286_v45 }
 0xc46   : > { %2597 = vtanh.f32 %v1287_v48 }
 0xc51   : > { %v2596_v47 = vpop.eup %2595 }
 0xc52   : > { %1294 = vrot.lane.b32.xlu1 %v2596_v47, %s2932_s19 }
 0xc53   : > { %v2598_v49 = vpop.eup %2597 }
 0xc54   : > { %v1289_v50 = vadd.f32 1.0, %v2598_v49 }
 0xc56   : > { %v1290_v51 = vmul.f32 0.5, %v1289_v50 }
 0xc58   : > { %v1292_v54 = vmul.f32 %v1290_v51, %v1204_v38 }
 0xcc4   : > { %v1295_v52 = vpop.permute.xlu1 %1294 }
 0xcc5   : > { %v1297_v53 = vmul.f32 %v1295_v52, %v1290_v51 }
 0xcc7   : > { %1299 = vrot.lane.b32.xlu0 %v1297_v53, %s2933_s24 }
 0xd39   : > { %v1300_v55 = vpop.permute.xlu0 %1299 }
 0xd3a   : > { %v1302_v56 = vadd.f32 %v1300_v55, %v1292_v54 }
 0xd3c   : > { %2599 = vtanh.f32 %v1302_v56 }
 0xd49   : > { %v2600_v57 = vpop.eup %2599 }
 0xd4a   : > { %1305 = vrot.lane.b32.xlu1 %v2600_v57, %s2932_s19 }
 0xdbc   : > { %v1306_v58 = vpop.permute.xlu1 %1305 }
 0xdbd   : > { %v1308_v59 = vmul.f32 %v1306_v58, %v1290_v51 }
 0xdbf   : > { %1310 = vrot.lane.b32.xlu0 %v1308_v59, %s2933_s24 }
 0xe31   : > { %v1311_v60 = vpop.permute.xlu0 %1310 }
 0xe32   : > { %2362 = vmatmul.mubr.msk.f32.vlgmr.msra.gmra.mxu1 %vm816_vm3, %v1311_v60 }
 0xe33   : > { %2376 = vmatpush3.msra.mxu1 %v3304_v3  ;;  %2383 = vmatprep.mubr.msk.f32.mxu1 %vm2931_vm2, %v2930_v5 }
 0xe34   : > { %2377 = vmatprep.subr.mxu1 %v2930_v5 }
 0xe35   : > { %2378 = vmatpush3.msra.mxu1 %v3315_v7 }
 0xe36   : > { %2379 = vmatprep.subr.mxu1 %v2930_v5 }
 0xe37   : > { %2380 = vmatpush3.msra.mxu1 %v3323_v9 }
 0xe38   : > { %2381 = vmatprep.subr.mxu1 %v2930_v5 }
 0xe39   : > { %2382 = vmatpush3.msra.mxu1 %v3331_v10 }
 0xef2   : > { %v1380_v1 = vpop.f32.mrf.mxu1 }
 0xef3   : > { %v1384_v3 = vadd.f32 %v1380_v1, %v797_v62 }
 0xef4   : > { %v2363_v2 = vpop.f32.mrf.mxu1 }
 0xef5   : > { %2601 = vtanh.f32 %v1384_v3  ;;  %v1385_v6 = vmul.f32 0.5, %v1384_v3 }
 0xef7   : > { %2603 = vtanh.f32 %v1385_v6 }
 0xf02   : > { %v2602_v4 = vpop.eup %2601 }
 0xf03   : > { %1392 = vrot.lane.b32.xlu1 %v2602_v4, %s2932_s19 }
 0xf04   : > { %v2604_v7 = vpop.eup %2603 }
 0xf05   : > { %v1387_v8 = vadd.f32 1.0, %v2604_v7 }
 0xf07   : > { %v1388_v11 = vmul.f32 0.5, %v1387_v8 }
 0xf09   : > { %v1390_v5 = vmul.f32 %v1388_v11, %v1302_v56 }
 0xf75   : > { %v1393_v9 = vpop.permute.xlu1 %1392 }
 0xf76   : > { %v1395_v12 = vmul.f32 %v1393_v9, %v1388_v11 }
 0xf78   : > { %1397 = vrot.lane.b32.xlu0 %v1395_v12, %s2933_s24 }
 0xfea   : > { %v1398_v10 = vpop.permute.xlu0 %1397 }
 0xfeb   : > { %v1400_v14 = vadd.f32 %v1398_v10, %v1390_v5 }
 0xfed   : > { %2605 = vtanh.f32 %v1400_v14 }
 0xffa   : > { %v2606_v61 = vpop.eup %2605 }
 0xffb   : > { %1403 = vrot.lane.b32.xlu1 %v2606_v61, %s2932_s19 }
0x106d   : > { %v1404_v15 = vpop.permute.xlu1 %1403 }
0x106e   : > { %v1406_v16 = vmul.f32 %v1404_v15, %v1388_v11 }
0x1070   : > { %1408 = vrot.lane.b32.xlu0 %v1406_v16, %s2933_s24 }
0x10e2   : > { %v1409_v17 = vpop.permute.xlu0 %1408 }
0x10e3   : > { %2373 = vmatmul.mubr.msk.f32.vlgmr.msra.gmra.mxu0 %vm816_vm3, %v1409_v17 }
0x11a3   : > { %v1478_v19 = vpop.f32.mrf.mxu0 }
0x11a4   : > { %v1482_v20 = vadd.f32 %v1478_v19, %v802_v18 }
0x11a5   : > { %v2374_v21 = vpop.f32.mrf.mxu0 }
0x11a6   : > { %2607 = vtanh.f32 %v1482_v20  ;;  %v1483_v23 = vmul.f32 0.5, %v1482_v20 }
0x11a8   : > { %2609 = vtanh.f32 %v1483_v23 }
0x11b3   : > { %v2608_v22 = vpop.eup %2607 }
0x11b4   : > { %1490 = vrot.lane.b32.xlu1 %v2608_v22, %s2932_s19 }
0x11b5   : > { %v2610_v24 = vpop.eup %2609 }
0x11b6   : > { %v1485_v25 = vadd.f32 1.0, %v2610_v24 }
0x11b8   : > { %v1486_v26 = vmul.f32 0.5, %v1485_v25 }
0x11ba   : > { %v1488_v29 = vmul.f32 %v1486_v26, %v1400_v14 }
0x1226   : > { %v1491_v27 = vpop.permute.xlu1 %1490 }
0x1227   : > { %v1493_v28 = vmul.f32 %v1491_v27, %v1486_v26 }
0x1229   : > { %1495 = vrot.lane.b32.xlu0 %v1493_v28, %s2933_s24 }
0x129b   : > { %v1496_v30 = vpop.permute.xlu0 %1495 }
0x129c   : > { %v1498_v31 = vadd.f32 %v1496_v30, %v1488_v29 }
0x129e   : > { %2611 = vtanh.f32 %v1498_v31 }
0x12ab   : > { %v2612_v0 = vpop.eup %2611 }
0x12ac   : > { %1501 = vrot.lane.b32.xlu1 %v2612_v0, %s2932_s19 }
0x131e   : > { %v1502_v32 = vpop.permute.xlu1 %1501 }
0x131f   : > { %v1504_v33 = vmul.f32 %v1502_v32, %v1486_v26 }
0x1321   : > { %1506 = vrot.lane.b32.xlu0 %v1504_v33, %s2933_s24 }
0x1393   : > { %v1507_v34 = vpop.permute.xlu0 %1506 }
0x1394   : > { %2384 = vmatmul.mubr.msk.f32.vlgmr.msra.gmra.mxu1 %vm816_vm3, %v1507_v34 }
0x1454   : > { %v1576_v36 = vpop.f32.mrf.mxu1 }
0x1455   : > { %v1580_v37 = vadd.f32 %v1576_v36, %v807_v35 }
0x1456   : > { %v2385_v38 = vpop.f32.mrf.mxu1 }
0x1457   : > { %2613 = vtanh.f32 %v1580_v37  ;;  %v1581_v40 = vmul.f32 0.5, %v1580_v37 }
0x1459   : > { %2615 = vtanh.f32 %v1581_v40 }
0x1464   : > { %v2614_v39 = vpop.eup %2613 }
0x1465   : > { %1588 = vrot.lane.b32.xlu1 %v2614_v39, %s2932_s19 }
0x1466   : > { %v2616_v41 = vpop.eup %2615 }
0x1467   : > { %v1583_v42 = vadd.f32 1.0, %v2616_v41 }
0x1469   : > { %v1584_v43 = vmul.f32 0.5, %v1583_v42 }
0x146b   : > { %v1586_v46 = vmul.f32 %v1584_v43, %v1498_v31 }
0x14d7   : > { %v1589_v44 = vpop.permute.xlu1 %1588 }
0x14d8   : > { %v1591_v45 = vmul.f32 %v1589_v44, %v1584_v43 }
0x14da   : > { %1593 = vrot.lane.b32.xlu0 %v1591_v45, %s2933_s24 }
0x154c   : > { %v1594_v47 = vpop.permute.xlu0 %1593 }
0x154d   : > { %v1596_v48 = vadd.f32 %v1594_v47, %v1586_v46 }
0x154f   : > { %2617 = vtanh.f32 %v1596_v48 }
0x155c   : > { %v2618_v13 = vpop.eup %2617 }
0x155d   : > { %1599 = vrot.lane.b32.xlu1 %v2618_v13, %s2932_s19 }
0x1561   : > { %1609 = vrot.lane.b32.xlu1 %v1596_v48, %s2934_s20 }
0x15cf   : > { %v1600_v63 = vpop.permute.xlu1 %1599 }
0x15d0   : > { %v1602_v49 = vmul.f32 %v1600_v63, %v1584_v43 }
0x15d2   : > { %1604 = vrot.lane.b32.xlu0 %v1602_v49, %s2933_s24 }
0x15d3   : > { %v1610_v50 = vpop.permute.xlu1 %1609 }
0x15d4   : > { %1612 = vst.msk [vmem:[#allocation3] sm:$0xff] %vm816_vm3, %v1610_v50 }
0x1641   : > { %1616 = sbr.rel (%p2201_p4) target bundleno = 6599 (0x19c7), region = 108 }
0x1644   : > { %v3487_v51 = vpop.permute.xlu0 %1604 }
0x1645   : > { %1607 = vst.msk [vmem:[#allocation2] sm:$0xff] %vm816_vm3, %v3487_v51 }
0x1646   : > { %v1620_v52 = vld [vmem:[#allocation7 + $0x8] sm:$0xff]  ;;  %v2935_v54 = vmov 0.0   ;;  %v1619_v55 = vld [vmem:[#allocation7] sm:$0xff]  ;;  %v2202_v57 = vld [vmem:[%s3273_s2 + $0x38] sm:$0xff]  ;;  %vm2936_vm4 = vmmov 0  }
0x1647   : > { %v1706_v53 = vld [vmem:[%s3706_s11 + $0x18] sm:$0xff]  ;;  %2386 = vmatprep.subr.mxu0 %v2935_v54  ;;  %2393 = vmatprep.subr.mxu1 %v2935_v54  ;;  %v1705_v56 = vld [vmem:[%s3706_s11 + $0x10] sm:$0xff]  ;;  %v1704_v58 = vld [vmem:[%s3706_s11 + $0x8] sm:$0xff] }
0x1648   : > { %2387 = vmatpush3.msra.mxu0 %v1620_v52  ;;  %2394 = vmatpush3.msra.mxu1 %v1706_v53  ;;  %v1703_v59 = vld [vmem:[%s3706_s11] sm:$0xff]  ;;  %v1702_v11 = vld [vmem:[%s588_s5] sm:$0xff]  ;;  %s3708_s5 = sld [smem:[#allocation33_spill]]  ;;  %v1812_v24 = vld [vmem:[%s3709_s7 + $0x8] sm:$0xff] }
0x1649   : > { %2388 = vmatprep.subr.mxu0 %v2935_v54  ;;  %2395 = vmatprep.subr.mxu1 %v2935_v54  ;;  %v1701_v60 = vld [vmem:[%s579_s28] sm:$0xff]  ;;  %s2937_s28 = smov 64   ;;  %v1814_v20 = vld [vmem:[%s3709_s7 + $0x18] sm:$0xff]  ;;  %v1813_v22 = vld [vmem:[%s3709_s7 + $0x10] sm:$0xff] }
0x164a   : > { %2389 = vmatpush3.msra.mxu0 %v1619_v55  ;;  %2390 = vmatprep.mubr.msk.f32.mxu0 %vm2936_vm4, %v2935_v54  ;;  %v2203_v62 = vld [vmem:[%s3707_s0] ss:$0 sm:$0xff] }
0x164b   : > { %2396 = vmatpush3.msra.mxu1 %v1705_v56  ;;  %2391 = vmatmul.mubr.msk.f32.vlgmr.msra.gmra.mxu0 %vm680_vm1, %v2202_v57  ;;  %v1811_v26 = vld [vmem:[%s3709_s7] sm:$0xff] }
0x164c   : > { %2397 = vmatprep.subr.mxu1 %v2935_v54  ;;  %2401 = vmatprep.mubr.msk.f32.mxu1 %vm2936_vm4, %v2935_v54  ;;  %v2208_v33 = vld [vmem:[%s3710_s14] ss:$0 sm:$0xff] }
0x164d   : > { %2398 = vmatpush3.msra.mxu1 %v1704_v58  ;;  %2404 = vmatprep.subr.mxu0 %v2935_v54 }
0x164e   : > { %2399 = vmatprep.subr.mxu1 %v2935_v54  ;;  %2412 = vmatprep.mubr.msk.f32.mxu0 %vm2936_vm4, %v2935_v54  ;;  %v1810_v19 = vld [vmem:[%s3708_s5 + $0x18] sm:$0xff]  ;;  %v1809_v21 = vld [vmem:[%s3708_s5 + $0x10] sm:$0xff]  ;;  %v1808_v23 = vld [vmem:[%s3708_s5 + $0x8] sm:$0xff] }
0x164f   : > { %2400 = vmatpush3.msra.mxu1 %v1703_v59  ;;  %2405 = vmatpush3.msra.mxu0 %v1814_v20  ;;  %v1807_v25 = vld [vmem:[%s3708_s5] sm:$0xff] }
0x1650   : > { %2402 = vmatmul.mubr.msk.f32.vlgmr.msra.gmra.mxu1 %vm816_vm3, %v1701_v60  ;;  %2415 = vmatprep.subr.mxu1 %v2935_v54 }
0x1651   : > { %2423 = vmatprep.mubr.msk.f32.mxu1 %vm2936_vm4, %v2935_v54  ;;  %2416 = vmatpush3.msra.mxu1 %v1810_v19 }
0x1652   : > { %2417 = vmatprep.subr.mxu1 %v2935_v54  ;;  %2406 = vmatprep.subr.mxu0 %v2935_v54 }
0x1653   : > { %2418 = vmatpush3.msra.mxu1 %v1809_v21  ;;  %2407 = vmatpush3.msra.mxu0 %v1813_v22 }
0x1654   : > { %2419 = vmatprep.subr.mxu1 %v2935_v54  ;;  %2408 = vmatprep.subr.mxu0 %v2935_v54 }
0x1655   : > { %2420 = vmatpush3.msra.mxu1 %v1808_v23  ;;  %2409 = vmatpush3.msra.mxu0 %v1812_v24 }
0x1656   : > { %2421 = vmatprep.subr.mxu1 %v2935_v54  ;;  %2410 = vmatprep.subr.mxu0 %v2935_v54 }
0x1657   : > { %2422 = vmatpush3.msra.mxu1 %v1807_v25  ;;  %2411 = vmatpush3.msra.mxu0 %v1811_v26 }
0x1658   : > { %2424 = vmatmul.mubr.msk.f32.vlgmr.msra.gmra.mxu1 %vm816_vm3, %v3487_v51 }
0x170b   : > { %v1697_v1 = vpop.f32.mrf.mxu0 }
0x170c   : > { %v1698_v3 = vadd.f32 %v2203_v62, %v1697_v1 }
0x170d   : > { %v2392_v2 = vpop.f32.mrf.mxu0 }
0x1710   : > { %v1776_v4 = vpop.f32.mrf.mxu1 }
0x1711   : > { %v1780_v6 = vadd.f32 %v1776_v4, %v1698_v3 }
0x1712   : > { %v2403_v7 = vpop.f32.mrf.mxu1 }
0x1713   : > { %2619 = vtanh.f32 %v1780_v6  ;;  %v1781_v9 = vmul.f32 0.5, %v1780_v6 }
0x1715   : > { %2621 = vtanh.f32 %v1781_v9 }
0x1718   : > { %v1958_v30 = vpop.f32.mrf.mxu1 }
0x171a   : > { %v2425_v31 = vpop.f32.mrf.mxu1 }
0x1720   : > { %v2620_v8 = vpop.eup %2619 }
0x1721   : > { %1792 = vrot.lane.b32.xlu0 %v2620_v8, %s2937_s28 }
0x1722   : > { %v2622_v12 = vpop.eup %2621 }
0x1723   : > { %v1783_v5 = vadd.f32 1.0, %v2622_v12 }
0x1725   : > { %1787 = vrot.lane.b32.xlu0 %v1702_v11, %s2938_s12  ;;  %v1784_v10 = vmul.f32 0.5, %v1783_v5 }
0x1793   : > { %v1793_v14 = vpop.permute.xlu0 %1792 }
0x1794   : > { %v1795_v61 = vmul.f32 %v1793_v14, %v1784_v10 }
0x1796   : > { %1797 = vrot.lane.b32.xlu1 %v1795_v61, %s2938_s12 }
0x1797   : > { %v1788_v15 = vpop.permute.xlu0 %1787 }
0x1798   : > { %v1790_v16 = vmul.f32 %v1788_v15, %v1784_v10 }
0x1808   : > { %v1798_v17 = vpop.permute.xlu1 %1797 }
0x1809   : > { %v1800_v18 = vadd.f32 %v1798_v17, %v1790_v16 }
0x180b   : > { %2623 = vtanh.f32 %v1800_v18 }
0x1818   : > { %v2624_v27 = vpop.eup %2623 }
0x1819   : > { %1803 = vrot.lane.b32.xlu1 %v2624_v27, %s2937_s28 }
0x188b   : > { %v1804_v28 = vpop.permute.xlu1 %1803 }
0x188c   : > { %v1806_v29 = vmul.f32 %v1804_v28, %v1784_v10 }
0x188e   : > { %1816 = vrot.lane.b32.xlu0 %v1806_v29, %s2938_s12 }
0x1900   : > { %v1817_v0 = vpop.permute.xlu0 %1816 }
0x1901   : > { %2413 = vmatmul.mubr.msk.f32.vlgmr.msra.gmra.mxu0 %vm816_vm3, %v1817_v0 }
0x19c1   : > { %v1886_v32 = vpop.f32.mrf.mxu0 }
0x19c2   : > { %v1959_v34 = vadd.f32 %v1958_v30, %v1886_v32 }
0x19c3   : > { %v2414_v35 = vpop.f32.mrf.mxu0 }
0x19c4   : > { %v1969_v36 = vadd.f32 %v2208_v33, %v1959_v34 }
0x19c6   : > { %1970 = vst.msk [vmem:[%s652_s27] sm:$0xff] %vm680_vm1, %v1969_v36 }
0x19c7 PF: > { %s3711_s28 = sld [smem:[#allocation19_spill]]  ;;  %s1985_s2 = sshll.u32 %s652_s27, 4  ;;  %s1986_s2 = int_to_ptr.vmem [resolvable:$true] %s1985_s2 }
0x19c8   : > { %s3712_s4 = sld [smem:[#allocation36_spill]]  ;;  %s1972_s24 = scalar_lea.sflag [#allocation6], %s559_s8 }
0x19c9   : > { %s2791_s20 = scalar_lea.vmem %s1986_s2, 128  ;;  %p3713_p12 = scmp.ne.s32.totalorder %s3690_s10, 0 }
0x19ca   : > { %p2792_p3 = scmp.ne.s32.totalorder %s1986_s2, %s2791_s20  ;;  %s2939_s0 = smov [#allocation13]  }
0x19cb   : > { %s2795_s14 = sshll.u32 %s2939_s0, 4  ;;  %s2796_s14 = int_to_ptr.vmem [resolvable:$false] %s2795_s14 }
0x19cc   : > { %p2793_p6 = pnand %p2792_p3, %p3713_p12  ;;  %s2797_s5 = scalar_lea.vmem %s2796_s14, 256 }
0x19cd   : > { %s2210_s12 = sshll.u32 %s3711_s28, 7  ;;  %p2798_p9 = scmp.lt.s32.totalorder %s1986_s2, %s2796_s14 }
0x19ce   : > { %s1983_s19 = scalar_lea.hbm %s3712_s4, %s2210_s12  ;;  %p2794_p13 = pneg %p2793_p6 }
0x19cf   : > { %p2799_p1 = scmp.lt.s32.totalorder %s2797_s5, %s2791_s20 }
0x19d1   : > { %p2800_p8 = por %p2799_p1, %p2798_p9 }
0x19d3   : > { %p2801_p11 = pnand %p2800_p8, %p2794_p13 }
0x19d5   : > { %2804 = shalt.err (!%p2801_p11)
}
0x19d6   : > { %s2805_s28 = scalar_lea.hbm %s1983_s19, 128  ;;  %s2809_s27 = scalar_lea.hbm %s3712_s4, 256 }
0x19d7   : > { %p2806_p2 = scmp.ne.s32.totalorder %s1983_s19, %s2805_s28  ;;  %p2810_p10 = scmp.lt.s32.totalorder %s1983_s19, %s3712_s4 }
0x19d8   : > { %p2811_p5 = scmp.lt.s32.totalorder %s2809_s27, %s2805_s28 }
0x19d9   : > { %p2807_p0 = pnand %p2806_p2, %p3713_p12 }
0x19da   : > { %p2812_p4 = por %p2811_p5, %p2810_p10 }
0x19db   : > { %p2808_p7 = pneg %p2807_p0 }
0x19dd   : > { %p2813_p3 = pnand %p2812_p4, %p2808_p7 }
0x19df   : > { %2816 = shalt.err (!%p2813_p3)
}
0x19e0   : > { %2440 = dma.vmem_to_hbm [thread:$0]  (%p3713_p12), %s1986_s2, 128, %s1983_s19, %s1972_s24  }
0x19e1 PF: > { %p2469_p6 = scmp.ge.s32.totalorder %s2919_s23, 2  ;;  %s1997_s5 = sand.u32 1, %s2879_s29  }
0x19e2   : > { %p3714_p13 = scmp.ne.s32.totalorder %s3683_s1, 0  ;;  %s1998_s3 = scalar_lea.sflag [#allocation6], %s1997_s5 }
0x19e4   : > { %p2463_p9 = pnand %p2469_p6, %p3714_p13 }
0x19e6   : > { %p2464_p1 = pneg %p2463_p9 }
0x19e8   : > { %2874 = dma.done.wait (%p2464_p1), %s1998_s3, 128  }
0x19e9   : > { %2876 = vsyncadd (%p2464_p1), %s1998_s3, 4294967168  ;;  %s31_s23 = sadd.s32 1, %s2919_s23   ;;  %s3715_s10 = sld [smem:[#allocation20_spill]] }
0x19ea   : > { %p28_p8 = scmp.ge.s32.totalorder %s31_s23, 6   ;;  %s3716_s2 = sld [smem:[#allocation21_spill]] }
0x19eb   : > { %s3717_s29 = smov %s2883_s30  ;;  %s3718_s30 = smov %s2887_s15 }
0x19ec   : > { %s3719_s15 = smov %s3130_s26  ;;  %s3720_s16 = smov %s2895_s17 }
0x19ed   : > { %s3721_s17 = smov %s2899_s18  ;;  %s3722_s18 = smov %s3100_s6 }
0x19ee   : > { %s3723_s19 = smov %s2911_s21  ;;  %s3724_s20 = smov %s2915_s22 }
0x19ef   : > { %s3725_s21 = smov %s3715_s10  ;;  %30 = sbr.rel (!%p28_p8) target bundleno = 26 (0x1a), region = 178 }
0x19f0   : > { %s3726_s22 = smov %s3716_s2 }
0x19f4   :  { %2003 = vsyncpa [#allocation5], 1 }
0x19f5   :  { %2005 = vsyncpa [#allocation5 + $0x1], 1 }
0x19f6   :  { %2006 = vsyncpa [#allocation8], 1 }
0x19f7   :  { %2007 = vsyncpa [#allocation6], 1 }
0x19f8   :  { %2009 = vsyncpa [#allocation6 + $0x1], 1 }

</bundles_post_ra>
